<compile_context>
chip_gen: v6e
topology: v6e:2x2x1
jax: 0.10.0
libtpu: 0.0.40
codegen_flags: <defaults>
</compile_context>

<pallas_src>
import functools

import jax
import jax.numpy as jnp
from jax.experimental import pallas as pl
from jax.experimental.pallas import tpu as pltpu


def _net_kernel(x_ref, wih_ref, whh_ref, b_ref, w1_ref, b1_ref, w2_ref, b2_ref,
                o_ref):
    # Shapes (all static):
    #   x_ref   : (T*Bp, F)  time-major, batch padded to a multiple of 8
    #   wih_ref : (4, F, H)  per-gate input weights (pre-transposed), order [i,f,g,o]
    #   whh_ref : (4, H, H)  per-gate recurrent weights (pre-transposed)
    #   b_ref   : (4, 1, H)  per-gate (b_ih + b_hh)
    #   w1_ref  : (T*H, 26), b1_ref: (1, 26), w2_ref: (26, 2), b2_ref: (1, 2)
    #   o_ref   : (Bp, 2)
    H = whh_ref.shape[1]
    T = w1_ref.shape[0] // H
    Bp = x_ref.shape[0] // T

    x_all = x_ref[...]                                            # (T*Bp, F)

    # Prologue: input projection for all timesteps and all gates at once,
    # biases folded in. Four independent MXU dots replace 4*T tiny ones.
    gx = [jnp.dot(x_all, wih_ref[k], preferred_element_type=jnp.float32)
          + b_ref[k]
          for k in range(4)]                                      # each (T*Bp, H)
    whh = [whh_ref[k] for k in range(4)]                          # each (H, H)

    # Zero (h0, c0) == init_hidden(); z1 accumulates the fused lin1 matmul.
    h = jnp.zeros((Bp, H), jnp.float32)
    c = jnp.zeros((Bp, H), jnp.float32)
    z1 = jnp.zeros((Bp, w1_ref.shape[1]), jnp.float32)

    # Fully unrolled recurrence (T is static); state lives in vregs.
    for t in range(T):
        lo, hi = t * Bp, (t + 1) * Bp                             # static, sublane-aligned
        i_g = jax.nn.sigmoid(gx[0][lo:hi]
                             + jnp.dot(h, whh[0], preferred_element_type=jnp.float32))
        f_g = jax.nn.sigmoid(gx[1][lo:hi]
                             + jnp.dot(h, whh[1], preferred_element_type=jnp.float32))
        g_g = jnp.tanh(gx[2][lo:hi]
                       + jnp.dot(h, whh[2], preferred_element_type=jnp.float32))
        o_g = jax.nn.sigmoid(gx[3][lo:hi]
                             + jnp.dot(h, whh[3], preferred_element_type=jnp.float32))
        c = f_g * c + i_g * g_g
        h = o_g * jnp.tanh(c)
        # Fused "x.view(-1, frames**2) @ W1^T": feat = [h_0 | ... | h_{T-1}],
        # so feat @ W1^T = sum_t h_t @ W1^T[t*H:(t+1)*H, :]  (static row slice).
        z1 = z1 + jnp.dot(h, w1_ref[t * H:(t + 1) * H, :],
                          preferred_element_type=jnp.float32)

    z1 = jnp.maximum(z1 + b1_ref[...], 0.0)                       # ReLU(lin1)
    z2 = jnp.dot(z1, w2_ref[...],
                 preferred_element_type=jnp.float32) + b2_ref[...]  # lin2
    z2 = z2 - jnp.max(z2, axis=1, keepdims=True)                  # softmax(dim=1)
    e = jnp.exp(z2)
    o_ref[...] = e / jnp.sum(e, axis=1, keepdims=True)


@functools.partial(jax.jit)
def net_forward(x, params):
    """x: (B, T, F) batch-first, like the PyTorch module. Returns (B, 2)."""
    B, T, F = x.shape
    H = params["w_hh"].shape[1]
    # The fused lin1 trick (and the module's own view(-1, frames**2)) requires
    # hidden_size == frames (H == T); fail loudly otherwise.
    assert H == T, f"hidden_size ({H}) must equal frames ({T})"

    # Pad batch to full sublanes (multiple of 8); padded rows are discarded.
    Bp = ((B + 7) // 8) * 8
    x_tbf = jnp.transpose(x, (1, 0, 2)).astype(jnp.float32)        # (T, B, F)
    if Bp != B:
        x_tbf = jnp.pad(x_tbf, ((0, 0), (0, Bp - B), (0, 0)))
    x_flat = x_tbf.reshape(T * Bp, F)                              # time-major rows

    def split_gates(w):
        # PyTorch (4H, n) with gate order [i, f, g, o] -> (4, n, H) pre-transposed.
        return jnp.stack([w[k * H:(k + 1) * H, :].T for k in range(4)], axis=0)

    wih4 = split_gates(params["w_ih"])                             # (4, F, H)
    whh4 = split_gates(params["w_hh"])                             # (4, H, H)
    b4 = (params["b_ih"] + params["b_hh"]).reshape(4, 1, H)        # (4, 1, H)
    w1_t = params["w1"].T                                          # (T*H, 26)
    b1 = params["b1"].reshape(1, -1)
    w2_t = params["w2"].T                                          # (26, 2)
    b2 = params["b2"].reshape(1, -1)

    inputs = (x_flat, wih4, whh4, b4, w1_t, b1, w2_t, b2)
    vmem = pl.BlockSpec(memory_space=pltpu.MemorySpace.VMEM)  # whole-array in VMEM

    out = pl.pallas_call(
        _net_kernel,
        out_shape=jax.ShapeDtypeStruct((Bp, 2), jnp.float32),
        in_specs=[vmem] * len(inputs),
        out_specs=vmem,
    )(*inputs)
    return out[:B]


def net_reference(x, params):
    """Pure-JAX reference of the PyTorch forward (for verification)."""
    B, T, F = x.shape
    H = T
    w_ih, w_hh = params["w_ih"], params["w_hh"]
    b = params["b_ih"] + params["b_hh"]
    h = jnp.zeros((B, H), jnp.float32)
    c = jnp.zeros((B, H), jnp.float32)
    outs = []
    for t in range(T):
        g = x[:, t, :] @ w_ih.T + h @ w_hh.T + b
        i = jax.nn.sigmoid(g[:, :H])
        f = jax.nn.sigmoid(g[:, H:2 * H])
        gg = jnp.tanh(g[:, 2 * H:3 * H])
        o = jax.nn.sigmoid(g[:, 3 * H:])
        c = f * c + i * gg
        h = o * jnp.tanh(c)
        outs.append(h)
    feat = jnp.concatenate(outs, axis=1)                 # == view(-1, frames**2)
    z1 = jnp.maximum(feat @ params["w1"].T + params["b1"], 0.0)
    z2 = z1 @ params["w2"].T + params["b2"]
    return jax.nn.softmax(z2, axis=1)


if __name__ == "__main__":
    key = jax.random.PRNGKey(0)
    B, T, F = 2, 8, 16        # batch_size=2, frames=8 (seq len = hidden), features=16
    H = T
    ks = jax.random.split(key, 9)
    params = {
        "w_ih": 0.1 * jax.random.normal(ks[0], (4 * H, F), jnp.float32),
        "w_hh": 0.1 * jax.random.normal(ks[1], (4 * H, H), jnp.float32),
        "b_ih": 0.1 * jax.random.normal(ks[2], (4 * H,), jnp.float32),
        "b_hh": 0.1 * jax.random.normal(ks[3], (4 * H,), jnp.float32),
        "w1":   0.1 * jax.random.normal(ks[4], (26, H * H), jnp.float32),
        "b1":   0.1 * jax.random.normal(ks[5], (26,), jnp.float32),
        "w2":   0.1 * jax.random.normal(ks[6], (2, 26), jnp.float32),
        "b2":   0.1 * jax.random.normal(ks[7], (2,), jnp.float32),
    }
    x = jax.random.normal(ks[8], (B, T, F), jnp.float32)

    out = jax.block_until_ready(net_forward(x, params))
    ref = net_reference(x, params)

    assert out.shape == (B, 2)
    assert bool(jnp.allclose(out, ref, atol=5e-3, rtol=5e-3)), (out, ref)
    print("KERNEL_OK")
</pallas_src>

<mosaic_0001>
module attributes {stable_mosaic.version = 11 : i64} {
  func.func @_net_kernel(%arg0: memref<64x16xf32, #tpu.memory_space<vmem>>, %arg1: memref<4x16x8xf32, #tpu.memory_space<vmem>>, %arg2: memref<4x8x8xf32, #tpu.memory_space<vmem>>, %arg3: memref<4x1x8xf32, #tpu.memory_space<vmem>>, %arg4: memref<64x26xf32, #tpu.memory_space<vmem>>, %arg5: memref<1x26xf32, #tpu.memory_space<vmem>>, %arg6: memref<26x2xf32, #tpu.memory_space<vmem>>, %arg7: memref<1x2xf32, #tpu.memory_space<vmem>>, %arg8: memref<8x2xf32, #tpu.memory_space<vmem>>) attributes {dimension_semantics = [], scalar_prefetch = 0 : i64, scratch_operands = 0 : i64, tpu.core_type = #tpu.core_type<tc>} {
    %c0 = arith.constant 0 : index
    %c0_0 = arith.constant 0 : index
    %0 = vector.load %arg0[%c0, %c0_0] : memref<64x16xf32, #tpu.memory_space<vmem>>, vector<64x16xf32>
    %c0_1 = arith.constant 0 : index
    %c0_2 = arith.constant 0 : index
    %c0_3 = arith.constant 0 : index
    %1 = vector.load %arg1[%c0_1, %c0_2, %c0_3] : memref<4x16x8xf32, #tpu.memory_space<vmem>>, vector<1x16x8xf32>
    %2 = vector.shape_cast %1 : vector<1x16x8xf32> to vector<16x8xf32>
    %cst = arith.constant dense<0.000000e+00> : vector<64x8xf32>
    %3 = tpu.matmul %0, %2, %cst {dimension_numbers = #tpu.dot_dimension_numbers<[1], [0], [0], [1], [0, 0, 1, 1], [], []>} : vector<64x16xf32>, vector<16x8xf32>, vector<64x8xf32> -> vector<64x8xf32>
    %c0_4 = arith.constant 0 : index
    %c0_5 = arith.constant 0 : index
    %c0_6 = arith.constant 0 : index
    %4 = vector.load %arg3[%c0_4, %c0_5, %c0_6] : memref<4x1x8xf32, #tpu.memory_space<vmem>>, vector<1x1x8xf32>
    %5 = vector.shape_cast %4 : vector<1x1x8xf32> to vector<1x8xf32>
    %6 = vector.broadcast %5 : vector<1x8xf32> to vector<64x8xf32>
    %7 = arith.addf %3, %6 : vector<64x8xf32>
    %c1 = arith.constant 1 : index
    %c0_7 = arith.constant 0 : index
    %c0_8 = arith.constant 0 : index
    %8 = vector.load %arg1[%c1, %c0_7, %c0_8] : memref<4x16x8xf32, #tpu.memory_space<vmem>>, vector<1x16x8xf32>
    %9 = vector.shape_cast %8 : vector<1x16x8xf32> to vector<16x8xf32>
    %cst_9 = arith.constant dense<0.000000e+00> : vector<64x8xf32>
    %10 = tpu.matmul %0, %9, %cst_9 {dimension_numbers = #tpu.dot_dimension_numbers<[1], [0], [0], [1], [0, 0, 1, 1], [], []>} : vector<64x16xf32>, vector<16x8xf32>, vector<64x8xf32> -> vector<64x8xf32>
    %c1_10 = arith.constant 1 : index
    %c0_11 = arith.constant 0 : index
    %c0_12 = arith.constant 0 : index
    %11 = vector.load %arg3[%c1_10, %c0_11, %c0_12] : memref<4x1x8xf32, #tpu.memory_space<vmem>>, vector<1x1x8xf32>
    %12 = vector.shape_cast %11 : vector<1x1x8xf32> to vector<1x8xf32>
    %13 = vector.broadcast %12 : vector<1x8xf32> to vector<64x8xf32>
    %14 = arith.addf %10, %13 : vector<64x8xf32>
    %c2 = arith.constant 2 : index
    %c0_13 = arith.constant 0 : index
    %c0_14 = arith.constant 0 : index
    %15 = vector.load %arg1[%c2, %c0_13, %c0_14] : memref<4x16x8xf32, #tpu.memory_space<vmem>>, vector<1x16x8xf32>
    %16 = vector.shape_cast %15 : vector<1x16x8xf32> to vector<16x8xf32>
    %cst_15 = arith.constant dense<0.000000e+00> : vector<64x8xf32>
    %17 = tpu.matmul %0, %16, %cst_15 {dimension_numbers = #tpu.dot_dimension_numbers<[1], [0], [0], [1], [0, 0, 1, 1], [], []>} : vector<64x16xf32>, vector<16x8xf32>, vector<64x8xf32> -> vector<64x8xf32>
    %c2_16 = arith.constant 2 : index
    %c0_17 = arith.constant 0 : index
    %c0_18 = arith.constant 0 : index
    %18 = vector.load %arg3[%c2_16, %c0_17, %c0_18] : memref<4x1x8xf32, #tpu.memory_space<vmem>>, vector<1x1x8xf32>
    %19 = vector.shape_cast %18 : vector<1x1x8xf32> to vector<1x8xf32>
    %20 = vector.broadcast %19 : vector<1x8xf32> to vector<64x8xf32>
    %21 = arith.addf %17, %20 : vector<64x8xf32>
    %c3 = arith.constant 3 : index
    %c0_19 = arith.constant 0 : index
    %c0_20 = arith.constant 0 : index
    %22 = vector.load %arg1[%c3, %c0_19, %c0_20] : memref<4x16x8xf32, #tpu.memory_space<vmem>>, vector<1x16x8xf32>
    %23 = vector.shape_cast %22 : vector<1x16x8xf32> to vector<16x8xf32>
    %cst_21 = arith.constant dense<0.000000e+00> : vector<64x8xf32>
    %24 = tpu.matmul %0, %23, %cst_21 {dimension_numbers = #tpu.dot_dimension_numbers<[1], [0], [0], [1], [0, 0, 1, 1], [], []>} : vector<64x16xf32>, vector<16x8xf32>, vector<64x8xf32> -> vector<64x8xf32>
    %c3_22 = arith.constant 3 : index
    %c0_23 = arith.constant 0 : index
    %c0_24 = arith.constant 0 : index
    %25 = vector.load %arg3[%c3_22, %c0_23, %c0_24] : memref<4x1x8xf32, #tpu.memory_space<vmem>>, vector<1x1x8xf32>
    %26 = vector.shape_cast %25 : vector<1x1x8xf32> to vector<1x8xf32>
    %27 = vector.broadcast %26 : vector<1x8xf32> to vector<64x8xf32>
    %28 = arith.addf %24, %27 : vector<64x8xf32>
    %c0_25 = arith.constant 0 : index
    %c0_26 = arith.constant 0 : index
    %c0_27 = arith.constant 0 : index
    %29 = vector.load %arg2[%c0_25, %c0_26, %c0_27] : memref<4x8x8xf32, #tpu.memory_space<vmem>>, vector<1x8x8xf32>
    %30 = vector.shape_cast %29 : vector<1x8x8xf32> to vector<8x8xf32>
    %c1_28 = arith.constant 1 : index
    %c0_29 = arith.constant 0 : index
    %c0_30 = arith.constant 0 : index
    %31 = vector.load %arg2[%c1_28, %c0_29, %c0_30] : memref<4x8x8xf32, #tpu.memory_space<vmem>>, vector<1x8x8xf32>
    %32 = vector.shape_cast %31 : vector<1x8x8xf32> to vector<8x8xf32>
    %c2_31 = arith.constant 2 : index
    %c0_32 = arith.constant 0 : index
    %c0_33 = arith.constant 0 : index
    %33 = vector.load %arg2[%c2_31, %c0_32, %c0_33] : memref<4x8x8xf32, #tpu.memory_space<vmem>>, vector<1x8x8xf32>
    %34 = vector.shape_cast %33 : vector<1x8x8xf32> to vector<8x8xf32>
    %c3_34 = arith.constant 3 : index
    %c0_35 = arith.constant 0 : index
    %c0_36 = arith.constant 0 : index
    %35 = vector.load %arg2[%c3_34, %c0_35, %c0_36] : memref<4x8x8xf32, #tpu.memory_space<vmem>>, vector<1x8x8xf32>
    %36 = vector.shape_cast %35 : vector<1x8x8xf32> to vector<8x8xf32>
    %cst_37 = arith.constant 0.000000e+00 : f32
    %37 = vector.broadcast %cst_37 : f32 to vector<8x8xf32>
    %cst_38 = arith.constant 0.000000e+00 : f32
    %38 = vector.broadcast %cst_38 : f32 to vector<8x8xf32>
    %cst_39 = arith.constant 0.000000e+00 : f32
    %39 = vector.broadcast %cst_39 : f32 to vector<8x26xf32>
    %40 = vector.extract_strided_slice %7 {offsets = [0, 0], sizes = [8, 8], strides = [1, 1]} : vector<64x8xf32> to vector<8x8xf32>
    %cst_40 = arith.constant dense<0.000000e+00> : vector<8x8xf32>
    %41 = tpu.matmul %37, %30, %cst_40 {dimension_numbers = #tpu.dot_dimension_numbers<[1], [0], [0], [1], [0, 0, 1, 1], [], []>} : vector<8x8xf32>, vector<8x8xf32>, vector<8x8xf32> -> vector<8x8xf32>
    %42 = arith.addf %40, %41 : vector<8x8xf32>
    %43 = arith.negf %42 : vector<8x8xf32>
    %44 = math.exp %43 : vector<8x8xf32>
    %cst_41 = arith.constant 1.000000e+00 : f32
    %45 = vector.broadcast %cst_41 : f32 to vector<8x8xf32>
    %46 = arith.addf %45, %44 : vector<8x8xf32>
    %47 = arith.divf %45, %46 : vector<8x8xf32>
    %48 = vector.extract_strided_slice %14 {offsets = [0, 0], sizes = [8, 8], strides = [1, 1]} : vector<64x8xf32> to vector<8x8xf32>
    %cst_42 = arith.constant dense<0.000000e+00> : vector<8x8xf32>
    %49 = tpu.matmul %37, %32, %cst_42 {dimension_numbers = #tpu.dot_dimension_numbers<[1], [0], [0], [1], [0, 0, 1, 1], [], []>} : vector<8x8xf32>, vector<8x8xf32>, vector<8x8xf32> -> vector<8x8xf32>
    %50 = arith.addf %48, %49 : vector<8x8xf32>
    %51 = arith.negf %50 : vector<8x8xf32>
    %52 = math.exp %51 : vector<8x8xf32>
    %cst_43 = arith.constant 1.000000e+00 : f32
    %53 = vector.broadcast %cst_43 : f32 to vector<8x8xf32>
    %54 = arith.addf %53, %52 : vector<8x8xf32>
    %55 = arith.divf %53, %54 : vector<8x8xf32>
    %56 = vector.extract_strided_slice %21 {offsets = [0, 0], sizes = [8, 8], strides = [1, 1]} : vector<64x8xf32> to vector<8x8xf32>
    %cst_44 = arith.constant dense<0.000000e+00> : vector<8x8xf32>
    %57 = tpu.matmul %37, %34, %cst_44 {dimension_numbers = #tpu.dot_dimension_numbers<[1], [0], [0], [1], [0, 0, 1, 1], [], []>} : vector<8x8xf32>, vector<8x8xf32>, vector<8x8xf32> -> vector<8x8xf32>
    %58 = arith.addf %56, %57 : vector<8x8xf32>
    %59 = math.tanh %58 : vector<8x8xf32>
    %60 = vector.extract_strided_slice %28 {offsets = [0, 0], sizes = [8, 8], strides = [1, 1]} : vector<64x8xf32> to vector<8x8xf32>
    %cst_45 = arith.constant dense<0.000000e+00> : vector<8x8xf32>
    %61 = tpu.matmul %37, %36, %cst_45 {dimension_numbers = #tpu.dot_dimension_numbers<[1], [0], [0], [1], [0, 0, 1, 1], [], []>} : vector<8x8xf32>, vector<8x8xf32>, vector<8x8xf32> -> vector<8x8xf32>
    %62 = arith.addf %60, %61 : vector<8x8xf32>
    %63 = arith.negf %62 : vector<8x8xf32>
    %64 = math.exp %63 : vector<8x8xf32>
    %cst_46 = arith.constant 1.000000e+00 : f32
    %65 = vector.broadcast %cst_46 : f32 to vector<8x8xf32>
    %66 = arith.addf %65, %64 : vector<8x8xf32>
    %67 = arith.divf %65, %66 : vector<8x8xf32>
    %68 = arith.mulf %55, %38 : vector<8x8xf32>
    %69 = arith.mulf %47, %59 : vector<8x8xf32>
    %70 = arith.addf %68, %69 : vector<8x8xf32>
    %71 = math.tanh %70 : vector<8x8xf32>
    %72 = arith.mulf %67, %71 : vector<8x8xf32>
    %c0_47 = arith.constant 0 : index
    %c0_48 = arith.constant 0 : index
    %73 = vector.load %arg4[%c0_47, %c0_48] : memref<64x26xf32, #tpu.memory_space<vmem>>, vector<8x26xf32>
    %cst_49 = arith.constant dense<0.000000e+00> : vector<8x26xf32>
    %74 = tpu.matmul %72, %73, %cst_49 {dimension_numbers = #tpu.dot_dimension_numbers<[1], [0], [0], [1], [0, 0, 1, 1], [], []>} : vector<8x8xf32>, vector<8x26xf32>, vector<8x26xf32> -> vector<8x26xf32>
    %75 = arith.addf %39, %74 : vector<8x26xf32>
    %76 = vector.extract_strided_slice %7 {offsets = [8, 0], sizes = [8, 8], strides = [1, 1]} : vector<64x8xf32> to vector<8x8xf32>
    %cst_50 = arith.constant dense<0.000000e+00> : vector<8x8xf32>
    %77 = tpu.matmul %72, %30, %cst_50 {dimension_numbers = #tpu.dot_dimension_numbers<[1], [0], [0], [1], [0, 0, 1, 1], [], []>} : vector<8x8xf32>, vector<8x8xf32>, vector<8x8xf32> -> vector<8x8xf32>
    %78 = arith.addf %76, %77 : vector<8x8xf32>
    %79 = arith.negf %78 : vector<8x8xf32>
    %80 = math.exp %79 : vector<8x8xf32>
    %cst_51 = arith.constant 1.000000e+00 : f32
    %81 = vector.broadcast %cst_51 : f32 to vector<8x8xf32>
    %82 = arith.addf %81, %80 : vector<8x8xf32>
    %83 = arith.divf %81, %82 : vector<8x8xf32>
    %84 = vector.extract_strided_slice %14 {offsets = [8, 0], sizes = [8, 8], strides = [1, 1]} : vector<64x8xf32> to vector<8x8xf32>
    %cst_52 = arith.constant dense<0.000000e+00> : vector<8x8xf32>
    %85 = tpu.matmul %72, %32, %cst_52 {dimension_numbers = #tpu.dot_dimension_numbers<[1], [0], [0], [1], [0, 0, 1, 1], [], []>} : vector<8x8xf32>, vector<8x8xf32>, vector<8x8xf32> -> vector<8x8xf32>
    %86 = arith.addf %84, %85 : vector<8x8xf32>
    %87 = arith.negf %86 : vector<8x8xf32>
    %88 = math.exp %87 : vector<8x8xf32>
    %cst_53 = arith.constant 1.000000e+00 : f32
    %89 = vector.broadcast %cst_53 : f32 to vector<8x8xf32>
    %90 = arith.addf %89, %88 : vector<8x8xf32>
    %91 = arith.divf %89, %90 : vector<8x8xf32>
    %92 = vector.extract_strided_slice %21 {offsets = [8, 0], sizes = [8, 8], strides = [1, 1]} : vector<64x8xf32> to vector<8x8xf32>
    %cst_54 = arith.constant dense<0.000000e+00> : vector<8x8xf32>
    %93 = tpu.matmul %72, %34, %cst_54 {dimension_numbers = #tpu.dot_dimension_numbers<[1], [0], [0], [1], [0, 0, 1, 1], [], []>} : vector<8x8xf32>, vector<8x8xf32>, vector<8x8xf32> -> vector<8x8xf32>
    %94 = arith.addf %92, %93 : vector<8x8xf32>
    %95 = math.tanh %94 : vector<8x8xf32>
    %96 = vector.extract_strided_slice %28 {offsets = [8, 0], sizes = [8, 8], strides = [1, 1]} : vector<64x8xf32> to vector<8x8xf32>
    %cst_55 = arith.constant dense<0.000000e+00> : vector<8x8xf32>
    %97 = tpu.matmul %72, %36, %cst_55 {dimension_numbers = #tpu.dot_dimension_numbers<[1], [0], [0], [1], [0, 0, 1, 1], [], []>} : vector<8x8xf32>, vector<8x8xf32>, vector<8x8xf32> -> vector<8x8xf32>
    %98 = arith.addf %96, %97 : vector<8x8xf32>
    %99 = arith.negf %98 : vector<8x8xf32>
    %100 = math.exp %99 : vector<8x8xf32>
    %cst_56 = arith.constant 1.000000e+00 : f32
    %101 = vector.broadcast %cst_56 : f32 to vector<8x8xf32>
    %102 = arith.addf %101, %100 : vector<8x8xf32>
    %103 = arith.divf %101, %102 : vector<8x8xf32>
    %104 = arith.mulf %91, %70 : vector<8x8xf32>
    %105 = arith.mulf %83, %95 : vector<8x8xf32>
    %106 = arith.addf %104, %105 : vector<8x8xf32>
    %107 = math.tanh %106 : vector<8x8xf32>
    %108 = arith.mulf %103, %107 : vector<8x8xf32>
    %c8 = arith.constant 8 : index
    %c0_57 = arith.constant 0 : index
    %109 = vector.load %arg4[%c8, %c0_57] : memref<64x26xf32, #tpu.memory_space<vmem>>, vector<8x26xf32>
    %cst_58 = arith.constant dense<0.000000e+00> : vector<8x26xf32>
    %110 = tpu.matmul %108, %109, %cst_58 {dimension_numbers = #tpu.dot_dimension_numbers<[1], [0], [0], [1], [0, 0, 1, 1], [], []>} : vector<8x8xf32>, vector<8x26xf32>, vector<8x26xf32> -> vector<8x26xf32>
    %111 = arith.addf %75, %110 : vector<8x26xf32>
    %112 = vector.extract_strided_slice %7 {offsets = [16, 0], sizes = [8, 8], strides = [1, 1]} : vector<64x8xf32> to vector<8x8xf32>
    %cst_59 = arith.constant dense<0.000000e+00> : vector<8x8xf32>
    %113 = tpu.matmul %108, %30, %cst_59 {dimension_numbers = #tpu.dot_dimension_numbers<[1], [0], [0], [1], [0, 0, 1, 1], [], []>} : vector<8x8xf32>, vector<8x8xf32>, vector<8x8xf32> -> vector<8x8xf32>
    %114 = arith.addf %112, %113 : vector<8x8xf32>
    %115 = arith.negf %114 : vector<8x8xf32>
    %116 = math.exp %115 : vector<8x8xf32>
    %cst_60 = arith.constant 1.000000e+00 : f32
    %117 = vector.broadcast %cst_60 : f32 to vector<8x8xf32>
    %118 = arith.addf %117, %116 : vector<8x8xf32>
    %119 = arith.divf %117, %118 : vector<8x8xf32>
    %120 = vector.extract_strided_slice %14 {offsets = [16, 0], sizes = [8, 8], strides = [1, 1]} : vector<64x8xf32> to vector<8x8xf32>
    %cst_61 = arith.constant dense<0.000000e+00> : vector<8x8xf32>
    %121 = tpu.matmul %108, %32, %cst_61 {dimension_numbers = #tpu.dot_dimension_numbers<[1], [0], [0], [1], [0, 0, 1, 1], [], []>} : vector<8x8xf32>, vector<8x8xf32>, vector<8x8xf32> -> vector<8x8xf32>
    %122 = arith.addf %120, %121 : vector<8x8xf32>
    %123 = arith.negf %122 : vector<8x8xf32>
    %124 = math.exp %123 : vector<8x8xf32>
    %cst_62 = arith.constant 1.000000e+00 : f32
    %125 = vector.broadcast %cst_62 : f32 to vector<8x8xf32>
    %126 = arith.addf %125, %124 : vector<8x8xf32>
    %127 = arith.divf %125, %126 : vector<8x8xf32>
    %128 = vector.extract_strided_slice %21 {offsets = [16, 0], sizes = [8, 8], strides = [1, 1]} : vector<64x8xf32> to vector<8x8xf32>
    %cst_63 = arith.constant dense<0.000000e+00> : vector<8x8xf32>
    %129 = tpu.matmul %108, %34, %cst_63 {dimension_numbers = #tpu.dot_dimension_numbers<[1], [0], [0], [1], [0, 0, 1, 1], [], []>} : vector<8x8xf32>, vector<8x8xf32>, vector<8x8xf32> -> vector<8x8xf32>
    %130 = arith.addf %128, %129 : vector<8x8xf32>
    %131 = math.tanh %130 : vector<8x8xf32>
    %132 = vector.extract_strided_slice %28 {offsets = [16, 0], sizes = [8, 8], strides = [1, 1]} : vector<64x8xf32> to vector<8x8xf32>
    %cst_64 = arith.constant dense<0.000000e+00> : vector<8x8xf32>
    %133 = tpu.matmul %108, %36, %cst_64 {dimension_numbers = #tpu.dot_dimension_numbers<[1], [0], [0], [1], [0, 0, 1, 1], [], []>} : vector<8x8xf32>, vector<8x8xf32>, vector<8x8xf32> -> vector<8x8xf32>
    %134 = arith.addf %132, %133 : vector<8x8xf32>
    %135 = arith.negf %134 : vector<8x8xf32>
    %136 = math.exp %135 : vector<8x8xf32>
    %cst_65 = arith.constant 1.000000e+00 : f32
    %137 = vector.broadcast %cst_65 : f32 to vector<8x8xf32>
    %138 = arith.addf %137, %136 : vector<8x8xf32>
    %139 = arith.divf %137, %138 : vector<8x8xf32>
    %140 = arith.mulf %127, %106 : vector<8x8xf32>
    %141 = arith.mulf %119, %131 : vector<8x8xf32>
    %142 = arith.addf %140, %141 : vector<8x8xf32>
    %143 = math.tanh %142 : vector<8x8xf32>
    %144 = arith.mulf %139, %143 : vector<8x8xf32>
    %c16 = arith.constant 16 : index
    %c0_66 = arith.constant 0 : index
    %145 = vector.load %arg4[%c16, %c0_66] : memref<64x26xf32, #tpu.memory_space<vmem>>, vector<8x26xf32>
    %cst_67 = arith.constant dense<0.000000e+00> : vector<8x26xf32>
    %146 = tpu.matmul %144, %145, %cst_67 {dimension_numbers = #tpu.dot_dimension_numbers<[1], [0], [0], [1], [0, 0, 1, 1], [], []>} : vector<8x8xf32>, vector<8x26xf32>, vector<8x26xf32> -> vector<8x26xf32>
    %147 = arith.addf %111, %146 : vector<8x26xf32>
    %148 = vector.extract_strided_slice %7 {offsets = [24, 0], sizes = [8, 8], strides = [1, 1]} : vector<64x8xf32> to vector<8x8xf32>
    %cst_68 = arith.constant dense<0.000000e+00> : vector<8x8xf32>
    %149 = tpu.matmul %144, %30, %cst_68 {dimension_numbers = #tpu.dot_dimension_numbers<[1], [0], [0], [1], [0, 0, 1, 1], [], []>} : vector<8x8xf32>, vector<8x8xf32>, vector<8x8xf32> -> vector<8x8xf32>
    %150 = arith.addf %148, %149 : vector<8x8xf32>
    %151 = arith.negf %150 : vector<8x8xf32>
    %152 = math.exp %151 : vector<8x8xf32>
    %cst_69 = arith.constant 1.000000e+00 : f32
    %153 = vector.broadcast %cst_69 : f32 to vector<8x8xf32>
    %154 = arith.addf %153, %152 : vector<8x8xf32>
    %155 = arith.divf %153, %154 : vector<8x8xf32>
    %156 = vector.extract_strided_slice %14 {offsets = [24, 0], sizes = [8, 8], strides = [1, 1]} : vector<64x8xf32> to vector<8x8xf32>
    %cst_70 = arith.constant dense<0.000000e+00> : vector<8x8xf32>
    %157 = tpu.matmul %144, %32, %cst_70 {dimension_numbers = #tpu.dot_dimension_numbers<[1], [0], [0], [1], [0, 0, 1, 1], [], []>} : vector<8x8xf32>, vector<8x8xf32>, vector<8x8xf32> -> vector<8x8xf32>
    %158 = arith.addf %156, %157 : vector<8x8xf32>
    %159 = arith.negf %158 : vector<8x8xf32>
    %160 = math.exp %159 : vector<8x8xf32>
    %cst_71 = arith.constant 1.000000e+00 : f32
    %161 = vector.broadcast %cst_71 : f32 to vector<8x8xf32>
    %162 = arith.addf %161, %160 : vector<8x8xf32>
    %163 = arith.divf %161, %162 : vector<8x8xf32>
    %164 = vector.extract_strided_slice %21 {offsets = [24, 0], sizes = [8, 8], strides = [1, 1]} : vector<64x8xf32> to vector<8x8xf32>
    %cst_72 = arith.constant dense<0.000000e+00> : vector<8x8xf32>
    %165 = tpu.matmul %144, %34, %cst_72 {dimension_numbers = #tpu.dot_dimension_numbers<[1], [0], [0], [1], [0, 0, 1, 1], [], []>} : vector<8x8xf32>, vector<8x8xf32>, vector<8x8xf32> -> vector<8x8xf32>
    %166 = arith.addf %164, %165 : vector<8x8xf32>
    %167 = math.tanh %166 : vector<8x8xf32>
    %168 = vector.extract_strided_slice %28 {offsets = [24, 0], sizes = [8, 8], strides = [1, 1]} : vector<64x8xf32> to vector<8x8xf32>
    %cst_73 = arith.constant dense<0.000000e+00> : vector<8x8xf32>
    %169 = tpu.matmul %144, %36, %cst_73 {dimension_numbers = #tpu.dot_dimension_numbers<[1], [0], [0], [1], [0, 0, 1, 1], [], []>} : vector<8x8xf32>, vector<8x8xf32>, vector<8x8xf32> -> vector<8x8xf32>
    %170 = arith.addf %168, %169 : vector<8x8xf32>
    %171 = arith.negf %170 : vector<8x8xf32>
    %172 = math.exp %171 : vector<8x8xf32>
    %cst_74 = arith.constant 1.000000e+00 : f32
    %173 = vector.broadcast %cst_74 : f32 to vector<8x8xf32>
    %174 = arith.addf %173, %172 : vector<8x8xf32>
    %175 = arith.divf %173, %174 : vector<8x8xf32>
    %176 = arith.mulf %163, %142 : vector<8x8xf32>
    %177 = arith.mulf %155, %167 : vector<8x8xf32>
    %178 = arith.addf %176, %177 : vector<8x8xf32>
    %179 = math.tanh %178 : vector<8x8xf32>
    %180 = arith.mulf %175, %179 : vector<8x8xf32>
    %c24 = arith.constant 24 : index
    %c0_75 = arith.constant 0 : index
    %181 = vector.load %arg4[%c24, %c0_75] : memref<64x26xf32, #tpu.memory_space<vmem>>, vector<8x26xf32>
    %cst_76 = arith.constant dense<0.000000e+00> : vector<8x26xf32>
    %182 = tpu.matmul %180, %181, %cst_76 {dimension_numbers = #tpu.dot_dimension_numbers<[1], [0], [0], [1], [0, 0, 1, 1], [], []>} : vector<8x8xf32>, vector<8x26xf32>, vector<8x26xf32> -> vector<8x26xf32>
    %183 = arith.addf %147, %182 : vector<8x26xf32>
    %184 = vector.extract_strided_slice %7 {offsets = [32, 0], sizes = [8, 8], strides = [1, 1]} : vector<64x8xf32> to vector<8x8xf32>
    %cst_77 = arith.constant dense<0.000000e+00> : vector<8x8xf32>
    %185 = tpu.matmul %180, %30, %cst_77 {dimension_numbers = #tpu.dot_dimension_numbers<[1], [0], [0], [1], [0, 0, 1, 1], [], []>} : vector<8x8xf32>, vector<8x8xf32>, vector<8x8xf32> -> vector<8x8xf32>
    %186 = arith.addf %184, %185 : vector<8x8xf32>
    %187 = arith.negf %186 : vector<8x8xf32>
    %188 = math.exp %187 : vector<8x8xf32>
    %cst_78 = arith.constant 1.000000e+00 : f32
    %189 = vector.broadcast %cst_78 : f32 to vector<8x8xf32>
    %190 = arith.addf %189, %188 : vector<8x8xf32>
    %191 = arith.divf %189, %190 : vector<8x8xf32>
    %192 = vector.extract_strided_slice %14 {offsets = [32, 0], sizes = [8, 8], strides = [1, 1]} : vector<64x8xf32> to vector<8x8xf32>
    %cst_79 = arith.constant dense<0.000000e+00> : vector<8x8xf32>
    %193 = tpu.matmul %180, %32, %cst_79 {dimension_numbers = #tpu.dot_dimension_numbers<[1], [0], [0], [1], [0, 0, 1, 1], [], []>} : vector<8x8xf32>, vector<8x8xf32>, vector<8x8xf32> -> vector<8x8xf32>
    %194 = arith.addf %192, %193 : vector<8x8xf32>
    %195 = arith.negf %194 : vector<8x8xf32>
    %196 = math.exp %195 : vector<8x8xf32>
    %cst_80 = arith.constant 1.000000e+00 : f32
    %197 = vector.broadcast %cst_80 : f32 to vector<8x8xf32>
    %198 = arith.addf %197, %196 : vector<8x8xf32>
    %199 = arith.divf %197, %198 : vector<8x8xf32>
    %200 = vector.extract_strided_slice %21 {offsets = [32, 0], sizes = [8, 8], strides = [1, 1]} : vector<64x8xf32> to vector<8x8xf32>
    %cst_81 = arith.constant dense<0.000000e+00> : vector<8x8xf32>
    %201 = tpu.matmul %180, %34, %cst_81 {dimension_numbers = #tpu.dot_dimension_numbers<[1], [0], [0], [1], [0, 0, 1, 1], [], []>} : vector<8x8xf32>, vector<8x8xf32>, vector<8x8xf32> -> vector<8x8xf32>
    %202 = arith.addf %200, %201 : vector<8x8xf32>
    %203 = math.tanh %202 : vector<8x8xf32>
    %204 = vector.extract_strided_slice %28 {offsets = [32, 0], sizes = [8, 8], strides = [1, 1]} : vector<64x8xf32> to vector<8x8xf32>
    %cst_82 = arith.constant dense<0.000000e+00> : vector<8x8xf32>
    %205 = tpu.matmul %180, %36, %cst_82 {dimension_numbers = #tpu.dot_dimension_numbers<[1], [0], [0], [1], [0, 0, 1, 1], [], []>} : vector<8x8xf32>, vector<8x8xf32>, vector<8x8xf32> -> vector<8x8xf32>
    %206 = arith.addf %204, %205 : vector<8x8xf32>
    %207 = arith.negf %206 : vector<8x8xf32>
    %208 = math.exp %207 : vector<8x8xf32>
    %cst_83 = arith.constant 1.000000e+00 : f32
    %209 = vector.broadcast %cst_83 : f32 to vector<8x8xf32>
    %210 = arith.addf %209, %208 : vector<8x8xf32>
    %211 = arith.divf %209, %210 : vector<8x8xf32>
    %212 = arith.mulf %199, %178 : vector<8x8xf32>
    %213 = arith.mulf %191, %203 : vector<8x8xf32>
    %214 = arith.addf %212, %213 : vector<8x8xf32>
    %215 = math.tanh %214 : vector<8x8xf32>
    %216 = arith.mulf %211, %215 : vector<8x8xf32>
    %c32 = arith.constant 32 : index
    %c0_84 = arith.constant 0 : index
    %217 = vector.load %arg4[%c32, %c0_84] : memref<64x26xf32, #tpu.memory_space<vmem>>, vector<8x26xf32>
    %cst_85 = arith.constant dense<0.000000e+00> : vector<8x26xf32>
    %218 = tpu.matmul %216, %217, %cst_85 {dimension_numbers = #tpu.dot_dimension_numbers<[1], [0], [0], [1], [0, 0, 1, 1], [], []>} : vector<8x8xf32>, vector<8x26xf32>, vector<8x26xf32> -> vector<8x26xf32>
    %219 = arith.addf %183, %218 : vector<8x26xf32>
    %220 = vector.extract_strided_slice %7 {offsets = [40, 0], sizes = [8, 8], strides = [1, 1]} : vector<64x8xf32> to vector<8x8xf32>
    %cst_86 = arith.constant dense<0.000000e+00> : vector<8x8xf32>
    %221 = tpu.matmul %216, %30, %cst_86 {dimension_numbers = #tpu.dot_dimension_numbers<[1], [0], [0], [1], [0, 0, 1, 1], [], []>} : vector<8x8xf32>, vector<8x8xf32>, vector<8x8xf32> -> vector<8x8xf32>
    %222 = arith.addf %220, %221 : vector<8x8xf32>
    %223 = arith.negf %222 : vector<8x8xf32>
    %224 = math.exp %223 : vector<8x8xf32>
    %cst_87 = arith.constant 1.000000e+00 : f32
    %225 = vector.broadcast %cst_87 : f32 to vector<8x8xf32>
    %226 = arith.addf %225, %224 : vector<8x8xf32>
    %227 = arith.divf %225, %226 : vector<8x8xf32>
    %228 = vector.extract_strided_slice %14 {offsets = [40, 0], sizes = [8, 8], strides = [1, 1]} : vector<64x8xf32> to vector<8x8xf32>
    %cst_88 = arith.constant dense<0.000000e+00> : vector<8x8xf32>
    %229 = tpu.matmul %216, %32, %cst_88 {dimension_numbers = #tpu.dot_dimension_numbers<[1], [0], [0], [1], [0, 0, 1, 1], [], []>} : vector<8x8xf32>, vector<8x8xf32>, vector<8x8xf32> -> vector<8x8xf32>
    %230 = arith.addf %228, %229 : vector<8x8xf32>
    %231 = arith.negf %230 : vector<8x8xf32>
    %232 = math.exp %231 : vector<8x8xf32>
    %cst_89 = arith.constant 1.000000e+00 : f32
    %233 = vector.broadcast %cst_89 : f32 to vector<8x8xf32>
    %234 = arith.addf %233, %232 : vector<8x8xf32>
    %235 = arith.divf %233, %234 : vector<8x8xf32>
    %236 = vector.extract_strided_slice %21 {offsets = [40, 0], sizes = [8, 8], strides = [1, 1]} : vector<64x8xf32> to vector<8x8xf32>
    %cst_90 = arith.constant dense<0.000000e+00> : vector<8x8xf32>
    %237 = tpu.matmul %216, %34, %cst_90 {dimension_numbers = #tpu.dot_dimension_numbers<[1], [0], [0], [1], [0, 0, 1, 1], [], []>} : vector<8x8xf32>, vector<8x8xf32>, vector<8x8xf32> -> vector<8x8xf32>
    %238 = arith.addf %236, %237 : vector<8x8xf32>
    %239 = math.tanh %238 : vector<8x8xf32>
    %240 = vector.extract_strided_slice %28 {offsets = [40, 0], sizes = [8, 8], strides = [1, 1]} : vector<64x8xf32> to vector<8x8xf32>
    %cst_91 = arith.constant dense<0.000000e+00> : vector<8x8xf32>
    %241 = tpu.matmul %216, %36, %cst_91 {dimension_numbers = #tpu.dot_dimension_numbers<[1], [0], [0], [1], [0, 0, 1, 1], [], []>} : vector<8x8xf32>, vector<8x8xf32>, vector<8x8xf32> -> vector<8x8xf32>
    %242 = arith.addf %240, %241 : vector<8x8xf32>
    %243 = arith.negf %242 : vector<8x8xf32>
    %244 = math.exp %243 : vector<8x8xf32>
    %cst_92 = arith.constant 1.000000e+00 : f32
    %245 = vector.broadcast %cst_92 : f32 to vector<8x8xf32>
    %246 = arith.addf %245, %244 : vector<8x8xf32>
    %247 = arith.divf %245, %246 : vector<8x8xf32>
    %248 = arith.mulf %235, %214 : vector<8x8xf32>
    %249 = arith.mulf %227, %239 : vector<8x8xf32>
    %250 = arith.addf %248, %249 : vector<8x8xf32>
    %251 = math.tanh %250 : vector<8x8xf32>
    %252 = arith.mulf %247, %251 : vector<8x8xf32>
    %c40 = arith.constant 40 : index
    %c0_93 = arith.constant 0 : index
    %253 = vector.load %arg4[%c40, %c0_93] : memref<64x26xf32, #tpu.memory_space<vmem>>, vector<8x26xf32>
    %cst_94 = arith.constant dense<0.000000e+00> : vector<8x26xf32>
    %254 = tpu.matmul %252, %253, %cst_94 {dimension_numbers = #tpu.dot_dimension_numbers<[1], [0], [0], [1], [0, 0, 1, 1], [], []>} : vector<8x8xf32>, vector<8x26xf32>, vector<8x26xf32> -> vector<8x26xf32>
    %255 = arith.addf %219, %254 : vector<8x26xf32>
    %256 = vector.extract_strided_slice %7 {offsets = [48, 0], sizes = [8, 8], strides = [1, 1]} : vector<64x8xf32> to vector<8x8xf32>
    %cst_95 = arith.constant dense<0.000000e+00> : vector<8x8xf32>
    %257 = tpu.matmul %252, %30, %cst_95 {dimension_numbers = #tpu.dot_dimension_numbers<[1], [0], [0], [1], [0, 0, 1, 1], [], []>} : vector<8x8xf32>, vector<8x8xf32>, vector<8x8xf32> -> vector<8x8xf32>
    %258 = arith.addf %256, %257 : vector<8x8xf32>
    %259 = arith.negf %258 : vector<8x8xf32>
    %260 = math.exp %259 : vector<8x8xf32>
    %cst_96 = arith.constant 1.000000e+00 : f32
    %261 = vector.broadcast %cst_96 : f32 to vector<8x8xf32>
    %262 = arith.addf %261, %260 : vector<8x8xf32>
    %263 = arith.divf %261, %262 : vector<8x8xf32>
    %264 = vector.extract_strided_slice %14 {offsets = [48, 0], sizes = [8, 8], strides = [1, 1]} : vector<64x8xf32> to vector<8x8xf32>
    %cst_97 = arith.constant dense<0.000000e+00> : vector<8x8xf32>
    %265 = tpu.matmul %252, %32, %cst_97 {dimension_numbers = #tpu.dot_dimension_numbers<[1], [0], [0], [1], [0, 0, 1, 1], [], []>} : vector<8x8xf32>, vector<8x8xf32>, vector<8x8xf32> -> vector<8x8xf32>
    %266 = arith.addf %264, %265 : vector<8x8xf32>
    %267 = arith.negf %266 : vector<8x8xf32>
    %268 = math.exp %267 : vector<8x8xf32>
    %cst_98 = arith.constant 1.000000e+00 : f32
    %269 = vector.broadcast %cst_98 : f32 to vector<8x8xf32>
    %270 = arith.addf %269, %268 : vector<8x8xf32>
    %271 = arith.divf %269, %270 : vector<8x8xf32>
    %272 = vector.extract_strided_slice %21 {offsets = [48, 0], sizes = [8, 8], strides = [1, 1]} : vector<64x8xf32> to vector<8x8xf32>
    %cst_99 = arith.constant dense<0.000000e+00> : vector<8x8xf32>
    %273 = tpu.matmul %252, %34, %cst_99 {dimension_numbers = #tpu.dot_dimension_numbers<[1], [0], [0], [1], [0, 0, 1, 1], [], []>} : vector<8x8xf32>, vector<8x8xf32>, vector<8x8xf32> -> vector<8x8xf32>
    %274 = arith.addf %272, %273 : vector<8x8xf32>
    %275 = math.tanh %274 : vector<8x8xf32>
    %276 = vector.extract_strided_slice %28 {offsets = [48, 0], sizes = [8, 8], strides = [1, 1]} : vector<64x8xf32> to vector<8x8xf32>
    %cst_100 = arith.constant dense<0.000000e+00> : vector<8x8xf32>
    %277 = tpu.matmul %252, %36, %cst_100 {dimension_numbers = #tpu.dot_dimension_numbers<[1], [0], [0], [1], [0, 0, 1, 1], [], []>} : vector<8x8xf32>, vector<8x8xf32>, vector<8x8xf32> -> vector<8x8xf32>
    %278 = arith.addf %276, %277 : vector<8x8xf32>
    %279 = arith.negf %278 : vector<8x8xf32>
    %280 = math.exp %279 : vector<8x8xf32>
    %cst_101 = arith.constant 1.000000e+00 : f32
    %281 = vector.broadcast %cst_101 : f32 to vector<8x8xf32>
    %282 = arith.addf %281, %280 : vector<8x8xf32>
    %283 = arith.divf %281, %282 : vector<8x8xf32>
    %284 = arith.mulf %271, %250 : vector<8x8xf32>
    %285 = arith.mulf %263, %275 : vector<8x8xf32>
    %286 = arith.addf %284, %285 : vector<8x8xf32>
    %287 = math.tanh %286 : vector<8x8xf32>
    %288 = arith.mulf %283, %287 : vector<8x8xf32>
    %c48 = arith.constant 48 : index
    %c0_102 = arith.constant 0 : index
    %289 = vector.load %arg4[%c48, %c0_102] : memref<64x26xf32, #tpu.memory_space<vmem>>, vector<8x26xf32>
    %cst_103 = arith.constant dense<0.000000e+00> : vector<8x26xf32>
    %290 = tpu.matmul %288, %289, %cst_103 {dimension_numbers = #tpu.dot_dimension_numbers<[1], [0], [0], [1], [0, 0, 1, 1], [], []>} : vector<8x8xf32>, vector<8x26xf32>, vector<8x26xf32> -> vector<8x26xf32>
    %291 = arith.addf %255, %290 : vector<8x26xf32>
    %292 = vector.extract_strided_slice %7 {offsets = [56, 0], sizes = [8, 8], strides = [1, 1]} : vector<64x8xf32> to vector<8x8xf32>
    %cst_104 = arith.constant dense<0.000000e+00> : vector<8x8xf32>
    %293 = tpu.matmul %288, %30, %cst_104 {dimension_numbers = #tpu.dot_dimension_numbers<[1], [0], [0], [1], [0, 0, 1, 1], [], []>} : vector<8x8xf32>, vector<8x8xf32>, vector<8x8xf32> -> vector<8x8xf32>
    %294 = arith.addf %292, %293 : vector<8x8xf32>
    %295 = arith.negf %294 : vector<8x8xf32>
    %296 = math.exp %295 : vector<8x8xf32>
    %cst_105 = arith.constant 1.000000e+00 : f32
    %297 = vector.broadcast %cst_105 : f32 to vector<8x8xf32>
    %298 = arith.addf %297, %296 : vector<8x8xf32>
    %299 = arith.divf %297, %298 : vector<8x8xf32>
    %300 = vector.extract_strided_slice %14 {offsets = [56, 0], sizes = [8, 8], strides = [1, 1]} : vector<64x8xf32> to vector<8x8xf32>
    %cst_106 = arith.constant dense<0.000000e+00> : vector<8x8xf32>
    %301 = tpu.matmul %288, %32, %cst_106 {dimension_numbers = #tpu.dot_dimension_numbers<[1], [0], [0], [1], [0, 0, 1, 1], [], []>} : vector<8x8xf32>, vector<8x8xf32>, vector<8x8xf32> -> vector<8x8xf32>
    %302 = arith.addf %300, %301 : vector<8x8xf32>
    %303 = arith.negf %302 : vector<8x8xf32>
    %304 = math.exp %303 : vector<8x8xf32>
    %cst_107 = arith.constant 1.000000e+00 : f32
    %305 = vector.broadcast %cst_107 : f32 to vector<8x8xf32>
    %306 = arith.addf %305, %304 : vector<8x8xf32>
    %307 = arith.divf %305, %306 : vector<8x8xf32>
    %308 = vector.extract_strided_slice %21 {offsets = [56, 0], sizes = [8, 8], strides = [1, 1]} : vector<64x8xf32> to vector<8x8xf32>
    %cst_108 = arith.constant dense<0.000000e+00> : vector<8x8xf32>
    %309 = tpu.matmul %288, %34, %cst_108 {dimension_numbers = #tpu.dot_dimension_numbers<[1], [0], [0], [1], [0, 0, 1, 1], [], []>} : vector<8x8xf32>, vector<8x8xf32>, vector<8x8xf32> -> vector<8x8xf32>
    %310 = arith.addf %308, %309 : vector<8x8xf32>
    %311 = math.tanh %310 : vector<8x8xf32>
    %312 = vector.extract_strided_slice %28 {offsets = [56, 0], sizes = [8, 8], strides = [1, 1]} : vector<64x8xf32> to vector<8x8xf32>
    %cst_109 = arith.constant dense<0.000000e+00> : vector<8x8xf32>
    %313 = tpu.matmul %288, %36, %cst_109 {dimension_numbers = #tpu.dot_dimension_numbers<[1], [0], [0], [1], [0, 0, 1, 1], [], []>} : vector<8x8xf32>, vector<8x8xf32>, vector<8x8xf32> -> vector<8x8xf32>
    %314 = arith.addf %312, %313 : vector<8x8xf32>
    %315 = arith.negf %314 : vector<8x8xf32>
    %316 = math.exp %315 : vector<8x8xf32>
    %cst_110 = arith.constant 1.000000e+00 : f32
    %317 = vector.broadcast %cst_110 : f32 to vector<8x8xf32>
    %318 = arith.addf %317, %316 : vector<8x8xf32>
    %319 = arith.divf %317, %318 : vector<8x8xf32>
    %320 = arith.mulf %307, %286 : vector<8x8xf32>
    %321 = arith.mulf %299, %311 : vector<8x8xf32>
    %322 = arith.addf %320, %321 : vector<8x8xf32>
    %323 = math.tanh %322 : vector<8x8xf32>
    %324 = arith.mulf %319, %323 : vector<8x8xf32>
    %c56 = arith.constant 56 : index
    %c0_111 = arith.constant 0 : index
    %325 = vector.load %arg4[%c56, %c0_111] : memref<64x26xf32, #tpu.memory_space<vmem>>, vector<8x26xf32>
    %cst_112 = arith.constant dense<0.000000e+00> : vector<8x26xf32>
    %326 = tpu.matmul %324, %325, %cst_112 {dimension_numbers = #tpu.dot_dimension_numbers<[1], [0], [0], [1], [0, 0, 1, 1], [], []>} : vector<8x8xf32>, vector<8x26xf32>, vector<8x26xf32> -> vector<8x26xf32>
    %327 = arith.addf %291, %326 : vector<8x26xf32>
    %c0_113 = arith.constant 0 : index
    %c0_114 = arith.constant 0 : index
    %328 = vector.load %arg5[%c0_113, %c0_114] : memref<1x26xf32, #tpu.memory_space<vmem>>, vector<1x26xf32>
    %329 = vector.broadcast %328 : vector<1x26xf32> to vector<8x26xf32>
    %330 = arith.addf %327, %329 : vector<8x26xf32>
    %cst_115 = arith.constant 0.000000e+00 : f32
    %331 = vector.broadcast %cst_115 : f32 to vector<8x26xf32>
    %332 = arith.maximumf %330, %331 : vector<8x26xf32>
    %c0_116 = arith.constant 0 : index
    %c0_117 = arith.constant 0 : index
    %333 = vector.load %arg6[%c0_116, %c0_117] : memref<26x2xf32, #tpu.memory_space<vmem>>, vector<26x2xf32>
    %cst_118 = arith.constant dense<0.000000e+00> : vector<8x2xf32>
    %334 = tpu.matmul %332, %333, %cst_118 {dimension_numbers = #tpu.dot_dimension_numbers<[1], [0], [0], [1], [0, 0, 1, 1], [], []>} : vector<8x26xf32>, vector<26x2xf32>, vector<8x2xf32> -> vector<8x2xf32>
    %c0_119 = arith.constant 0 : index
    %c0_120 = arith.constant 0 : index
    %335 = vector.load %arg7[%c0_119, %c0_120] : memref<1x2xf32, #tpu.memory_space<vmem>>, vector<1x2xf32>
    %336 = vector.broadcast %335 : vector<1x2xf32> to vector<8x2xf32>
    %337 = arith.addf %334, %336 : vector<8x2xf32>
    %cst_121 = arith.constant dense<0xFF800000> : vector<8xf32>
    %338 = vector.multi_reduction <maximumf>, %337, %cst_121 [1] : vector<8x2xf32> to vector<8xf32>
    %339 = vector.shape_cast %338 : vector<8xf32> to vector<8x1xf32>
    %340 = vector.broadcast %339 : vector<8x1xf32> to vector<8x2xf32>
    %341 = arith.subf %337, %340 : vector<8x2xf32>
    %342 = math.exp %341 : vector<8x2xf32>
    %cst_122 = arith.constant dense<0.000000e+00> : vector<8xf32>
    %343 = vector.multi_reduction <add>, %342, %cst_122 [1] : vector<8x2xf32> to vector<8xf32>
    %344 = vector.shape_cast %343 : vector<8xf32> to vector<8x1xf32>
    %345 = vector.broadcast %344 : vector<8x1xf32> to vector<8x2xf32>
    %346 = arith.divf %342, %345 : vector<8x2xf32>
    %c0_123 = arith.constant 0 : index
    %c0_124 = arith.constant 0 : index
    %347 = vector.load %arg8[%c0_123, %c0_124] : memref<8x2xf32, #tpu.memory_space<vmem>>, vector<8x2xf32>
    tpu.vector_store %arg8[%c0_123, %c0_124], %346 {strides = array<i32>} : memref<8x2xf32, #tpu.memory_space<vmem>>, vector<8x2xf32>,
    return
  }
}

</mosaic_0001>

<bundles_post_ra>
// kernel: net_forward.1
= control target key start
LH: loop header
LB: loop body
LE: loop exit
PB: predicated region body
PF: predicated region fallthrough
CT: control target
= control target key end

     0   :  { %vm46_vm0 = vcmask 130048   ;;  %v4363_v16 = vmov 0.0   ;;  %vm4364_vm1 = vmmov 0   ;;  %vm531_vm2 = vcmask 64512   ;;  %s4873_s1 = inlined_call_operand.vmem [shape: f32[4,16,8], index: 1, kind: input, shape index: {}]   ;;  %s4874_s0 = inlined_call_operand.vmem [shape: f32[64,16], index: 0, kind: input, shape index: {}]   ;;  %s4875_s2 = inlined_call_operand.vmem [shape: f32[4,8,8], index: 2, kind: input, shape index: {}]   ;;  %s4876_s3 = inlined_call_operand.vmem [shape: f32[4,1,8], index: 3, kind: input, shape index: {}]   ;;  %s4877_s4 = inlined_call_operand.vmem [shape: f32[64,26], index: 4, kind: input, shape index: {}]   ;;  %s4878_s6 = inlined_call_operand.vmem [shape: f32[26,2], index: 6, kind: input, shape index: {}]   ;;  %s4879_s5 = inlined_call_operand.vmem [shape: f32[1,26], index: 5, kind: input, shape index: {}]   ;;  %s4880_s7 = inlined_call_operand.vmem [shape: f32[1,2], index: 7, kind: input, shape index: {}]   ;;  %s4881_s8 = inlined_call_operand.vmem [shape: f32[8,2], index: 8, kind: output, shape index: {}]  }
   0x1   :  { %v38_v0 = vld [vmem:[%s4873_s1 + $0x8] sm:$0xff]  ;;  %v37_v1 = vld [vmem:[%s4873_s1] sm:$0xff]  ;;  %v4422_v3 = vld [vmem:[%s4874_s0 + $0x30] sm:$0xff]  ;;  %vm3621_vm3 = vcmask 1041408   ;;  %vm3617_vm4 = vcmask 211968   ;;  %vm3695_vm5 = vcmask 15360  }
   0x2   :  { %3949 = vmatprep.subr.mxu0 %v38_v0  ;;  %4224 = vmatprep.subr.mxu1 %v38_v0  ;;  %v29_v2 = vld [vmem:[%s4874_s0] sm:$0xff]  ;;  %v30_v4 = vld [vmem:[%s4874_s0 + $0x8] sm:$0xff]  ;;  %v4430_v5 = vld [vmem:[%s4874_s0 + $0x38] sm:$0xff] }
   0x3   :  { %3950 = vmatpush3.msra.mxu0 %v38_v0  ;;  %4226 = vmatpush3.msra.mxu1 %v38_v0  ;;  %v3722_v6 = vld [vmem:[%s4873_s1 + $0x18] sm:$0xff]  ;;  %v31_v7 = vld [vmem:[%s4874_s0 + $0x10] sm:$0xff]  ;;  %v3734_v9 = vld [vmem:[%s4873_s1 + $0x28] sm:$0xff] }
   0x4   :  { %3951 = vmatprep.subr.mxu0 %v37_v1  ;;  %4225 = vmatprep.subr.mxu1 %v37_v1  ;;  %v3721_v8 = vld [vmem:[%s4873_s1 + $0x10] sm:$0xff]  ;;  %v32_v10 = vld [vmem:[%s4874_s0 + $0x18] sm:$0xff]  ;;  %v33_v12 = vld [vmem:[%s4874_s0 + $0x20] sm:$0xff] }
   0x5   :  { %3952 = vmatpush3.msra.mxu0 %v37_v1  ;;  %4227 = vmatpush3.msra.mxu1 %v37_v1  ;;  %v3746_v11 = vld [vmem:[%s4873_s1 + $0x38] sm:$0xff]  ;;  %v34_v13 = vld [vmem:[%s4874_s0 + $0x28] sm:$0xff]  ;;  %v3733_v14 = vld [vmem:[%s4873_s1 + $0x20] sm:$0xff] }
   0x6   :  { %3953 = vmatprep.mubr.msk.f32.mxu0 %vm46_vm0, %v29_v2  ;;  %3962 = vmatprep.mubr.msk.f32.mxu1 %vm46_vm0, %v4422_v3  ;;  %v3745_v15 = vld [vmem:[%s4873_s1 + $0x30] sm:$0xff]  ;;  %v4483_v17 = vld [vmem:[%s4875_s2] sm:$0xff]  ;;  %v4500_v18 = vld [vmem:[%s4875_s2 + $0x8] sm:$0xff] }
   0x7   :  { %3954 = vmatmul.mubr.msk.f32.vlgmr.msra.gmra.mxu0 %vm46_vm0, %v30_v4  ;;  %3963 = vmatmul.mubr.msk.f32.vlgmr.msra.gmra.mxu1 %vm46_vm0, %v4430_v5  ;;  %v4518_v19 = vld [vmem:[%s4875_s2 + $0x10] sm:$0xff]  ;;  %v4539_v20 = vld [vmem:[%s4875_s2 + $0x18] sm:$0xff]  ;;  %v3712_v21 = vld [vmem:[%s4876_s3] ss:$0 sm:$0xff] }
   0x8   :  { %3965 = vmatprep.subr.mxu1 %v3722_v6  ;;  %3956 = vmatprep.mubr.msk.f32.mxu0 %vm46_vm0, %v31_v7  ;;  %v3724_v29 = vld [vmem:[%s4876_s3 + $0x1] ss:$0 sm:$0xff]  ;;  %v3736_v42 = vld [vmem:[%s4876_s3 + $0x2] ss:$0 sm:$0xff]  ;;  %v3748_v60 = vld [vmem:[%s4876_s3 + $0x3] ss:$0 sm:$0xff] }
   0x9   :  { %3966 = vmatpush3.msra.mxu1 %v3722_v6  ;;  %3969 = vmatprep.mubr.msk.f32.mxu1 %vm46_vm0, %v29_v2 }
   0xa   :  { %3967 = vmatprep.subr.mxu1 %v3721_v8  ;;  %3981 = vmatprep.subr.mxu0 %v3734_v9 }
   0xb   :  { %3968 = vmatpush3.msra.mxu1 %v3721_v8  ;;  %3957 = vmatmul.mubr.msk.f32.gmra.mxu0 %vm46_vm0, %v32_v10 }
   0xc   :  { %3970 = vmatmul.mubr.msk.f32.vlgmr.msra.gmra.mxu1 %vm46_vm0, %v30_v4  ;;  %3997 = vmatprep.subr.mxu1 %v3746_v11 }
   0xd   :  { %3998 = vmatpush3.msra.mxu1 %v3746_v11  ;;  %3959 = vmatprep.mubr.msk.f32.mxu0 %vm46_vm0, %v33_v12 }
   0xe   :  { %3972 = vmatprep.mubr.msk.f32.mxu1 %vm46_vm0, %v31_v7  ;;  %3982 = vmatpush3.msra.mxu0 %v3734_v9 }
   0xf   :  { %3960 = vmatmul.mubr.msk.f32.gmra.mxu0 %vm46_vm0, %v34_v13  ;;  %3983 = vmatprep.subr.mxu0 %v3733_v14 }
  0x10   :  { %3973 = vmatmul.mubr.msk.f32.gmra.mxu1 %vm46_vm0, %v32_v10  ;;  %3984 = vmatpush3.msra.mxu0 %v3733_v14 }
  0x11   :  { %3975 = vmatprep.mubr.msk.f32.mxu1 %vm46_vm0, %v33_v12  ;;  %3985 = vmatprep.mubr.msk.f32.mxu0 %vm46_vm0, %v29_v2 }
  0x12   :  { %3999 = vmatprep.subr.mxu1 %v3745_v15  ;;  %4013 = vmatprep.subr.mxu0 %v4363_v16 }
  0x13   :  { %3986 = vmatmul.mubr.msk.f32.vlgmr.msra.gmra.mxu0 %vm46_vm0, %v30_v4  ;;  %4000 = vmatpush3.msra.mxu1 %v3745_v15 }
  0x14   :  { %3976 = vmatmul.mubr.msk.f32.gmra.mxu1 %vm46_vm0, %v34_v13  ;;  %3988 = vmatprep.mubr.msk.f32.mxu0 %vm46_vm0, %v31_v7 }
  0x15   :  { %3978 = vmatprep.mubr.msk.f32.mxu1 %vm46_vm0, %v4422_v3  ;;  %4018 = vmatprep.subr.mxu1 %v4363_v16 }
  0x16   :  { %4014 = vmatpush3.msra.mxu0 %v4483_v17 }
  0x17   :  { %3989 = vmatmul.mubr.msk.f32.gmra.mxu0 %vm46_vm0, %v32_v10  ;;  %4023 = vmatprep.subr.mxu0 %v4363_v16 }
  0x18   :  { %3979 = vmatmul.mubr.msk.f32.gmra.mxu1 %vm46_vm0, %v4430_v5  ;;  %3991 = vmatprep.mubr.msk.f32.mxu0 %vm46_vm0, %v33_v12 }
  0x19   :  { %4001 = vmatprep.mubr.msk.f32.mxu1 %vm46_vm0, %v29_v2 }
  0x1b   :  { %3992 = vmatmul.mubr.msk.f32.gmra.mxu0 %vm46_vm0, %v34_v13 }
  0x1c   :  { %4002 = vmatmul.mubr.msk.f32.vlgmr.msra.gmra.mxu1 %vm46_vm0, %v30_v4  ;;  %3994 = vmatprep.mubr.msk.f32.mxu0 %vm46_vm0, %v4422_v3 }
  0x1d   :  { %4019 = vmatpush3.msra.mxu1 %v4500_v18  ;;  %4004 = vmatprep.mubr.msk.f32.mxu1 %vm46_vm0, %v31_v7 }
  0x1e   :  { %4028 = vmatprep.subr.mxu1 %v4363_v16 }
  0x1f   :  { %3995 = vmatmul.mubr.msk.f32.gmra.mxu0 %vm46_vm0, %v4430_v5 }
  0x20   :  { %4005 = vmatmul.mubr.msk.f32.gmra.mxu1 %vm46_vm0, %v32_v10  ;;  %4015 = vmatprep.mubr.msk.f32.mxu0 %vm4364_vm1, %v4363_v16 }
  0x21   :  { %4007 = vmatprep.mubr.msk.f32.mxu1 %vm46_vm0, %v33_v12 }
  0x23   :  { %4016 = vmatmul.mubr.f32.vlgmr.msra.gmra.mxu0 %v4363_v16 }
  0x24   :  { %4008 = vmatmul.mubr.msk.f32.gmra.mxu1 %vm46_vm0, %v34_v13  ;;  %4024 = vmatpush3.msra.mxu0 %v4518_v19 }
  0x25   :  { %4010 = vmatprep.mubr.msk.f32.mxu1 %vm46_vm0, %v4422_v3  ;;  %4025 = vmatprep.mubr.msk.f32.mxu0 %vm4364_vm1, %v4363_v16 }
  0x26   :  { %4033 = vmatprep.subr.mxu0 %v4363_v16 }
  0x27   :  { %4026 = vmatmul.mubr.f32.vlgmr.msra.gmra.mxu0 %v4363_v16 }
  0x28   :  { %4011 = vmatmul.mubr.msk.f32.gmra.mxu1 %vm46_vm0, %v4430_v5  ;;  %4034 = vmatpush3.msra.mxu0 %v4483_v17 }
  0x29   :  { %4020 = vmatprep.mubr.msk.f32.mxu1 %vm4364_vm1, %v4363_v16  ;;  %4035 = vmatprep.mubr.msk.f32.mxu0 %vm4364_vm1, %v4363_v16 }
  0x2a   :  { %4043 = vmatprep.subr.mxu0 %v4363_v16 }
  0x2c   :  { %4021 = vmatmul.mubr.f32.vlgmr.msra.gmra.mxu1 %v4363_v16 }
  0x2d   :  { %4029 = vmatpush3.msra.mxu1 %v4539_v20  ;;  %4030 = vmatprep.mubr.msk.f32.mxu1 %vm4364_vm1, %v4363_v16 }
  0x2e   :  { %4038 = vmatprep.subr.mxu1 %v4363_v16 }
  0x30   :  { %4031 = vmatmul.mubr.f32.vlgmr.msra.gmra.mxu1 %v4363_v16 }
  0x31   :  { %4039 = vmatpush3.msra.mxu1 %v4500_v18  ;;  %4040 = vmatprep.mubr.msk.f32.mxu1 %vm4364_vm1, %v4363_v16 }
  0x32   :  { %4048 = vmatprep.subr.mxu1 %v4363_v16 }
  0xc7   :  { %v3955_v22 = vpop.f32.mrf.mxu0  ;;  %v3964_v23 = vpop.f32.mrf.mxu1 }
  0xc8   :  { %v4555_v24 = vadd.f32 %v3955_v22, %v3712_v21  ;;  %v4557_v25 = vadd.f32 %v3964_v23, %v3712_v21 }
  0xc9   :  { %v137_v26 = vpop.f32.mrf.mxu0  ;;  %v167_v27 = vpop.f32.mrf.mxu1 }
  0xca   :  { %v4559_v28 = vadd.f32 %v3712_v21, %v167_v27  ;;  %v138_v10 = vadd.f32 %v3712_v21, %v137_v26 }
  0xcb   :  { %v3958_v30 = vpop.f32.mrf.mxu0 }
  0xcc   :  { %v4564_v31 = vadd.f32 %v3958_v30, %v3712_v21  ;;  %v3971_v32 = vpop.f32.mrf.mxu1 }
  0xcd   :  { %v4566_v33 = vadd.f32 %v3971_v32, %v3724_v29  ;;  %v147_v34 = vpop.f32.mrf.mxu0 }
  0xce   :  { %v4568_v35 = vadd.f32 %v3712_v21, %v147_v34  ;;  %v253_v36 = vpop.f32.mrf.mxu1 }
  0xcf   :  { %v3961_v37 = vpop.f32.mrf.mxu0 }
  0xd0   :  { %v4570_v38 = vadd.f32 %v3961_v37, %v3712_v21  ;;  %v3974_v39 = vpop.f32.mrf.mxu1 }
  0xd1   :  { %v4572_v40 = vadd.f32 %v3974_v39, %v3724_v29  ;;  %v157_v41 = vpop.f32.mrf.mxu0 }
  0xd2   :  { %v4577_v43 = vadd.f32 %v3712_v21, %v157_v41  ;;  %v263_v44 = vpop.f32.mrf.mxu1 }
  0xd3   :  { %v4579_v45 = vadd.f32 %v3724_v29, %v263_v44  ;;  %v3987_v46 = vpop.f32.mrf.mxu0  ;;  %v254_v44 = vadd.f32 %v3724_v29, %v253_v36 }
  0xd4   :  { %v3977_v47 = vpop.f32.mrf.mxu1  ;;  %v4581_v48 = vadd.f32 %v3987_v46, %v3736_v42 }
  0xd5   :  { %v4583_v49 = vadd.f32 %v3977_v47, %v3724_v29  ;;  %v369_v50 = vpop.f32.mrf.mxu0 }
  0xd6   :  { %v273_v51 = vpop.f32.mrf.mxu1 }
  0xd7   :  { %v4585_v52 = vadd.f32 %v3724_v29, %v273_v51  ;;  %v3990_v53 = vpop.f32.mrf.mxu0 }
  0xd8   :  { %v3980_v54 = vpop.f32.mrf.mxu1  ;;  %v4587_v55 = vadd.f32 %v3990_v53, %v3736_v42 }
  0xd9   :  { %v4589_v56 = vadd.f32 %v3980_v54, %v3724_v29  ;;  %v379_v57 = vpop.f32.mrf.mxu0 }
  0xda   :  { %v283_v58 = vpop.f32.mrf.mxu1  ;;  %v4591_v59 = vadd.f32 %v3736_v42, %v379_v57 }
  0xdb   :  { %v4596_v61 = vadd.f32 %v3724_v29, %v283_v58  ;;  %v3993_v62 = vpop.f32.mrf.mxu0 }
  0xdc   :  { %v4598_v63 = vadd.f32 %v3993_v62, %v3736_v42  ;;  %v4003_v0 = vpop.f32.mrf.mxu1 }
  0xdd   :  { %v4600_v1 = vadd.f32 %v4003_v0, %v3748_v60  ;;  %v389_v2 = vpop.f32.mrf.mxu0 }
  0xde   :  { %v4602_v3 = vadd.f32 %v3736_v42, %v389_v2  ;;  %v485_v4 = vpop.f32.mrf.mxu1 }
  0xdf   :  { %v3996_v5 = vpop.f32.mrf.mxu0  ;;  %v486_v62 = vadd.f32 %v3748_v60, %v485_v4 }
  0xe0   :  { %v4604_v6 = vadd.f32 %v3996_v5, %v3736_v42  ;;  %v4006_v7 = vpop.f32.mrf.mxu1  ;;  %v370_v5 = vadd.f32 %v3736_v42, %v369_v50 }
  0xe1   :  { %v4606_v8 = vadd.f32 %v4006_v7, %v3748_v60  ;;  %v399_v9 = vpop.f32.mrf.mxu0 }
  0xe2   :  { %v4608_v11 = vadd.f32 %v3736_v42, %v399_v9  ;;  %v495_v12 = vpop.f32.mrf.mxu1 }
  0xe3   :  { %v4610_v13 = vadd.f32 %v3748_v60, %v495_v12  ;;  %v601_v14 = vpop.f32.mrf.mxu0 }
  0xe4   :  { %v4009_v15 = vpop.f32.mrf.mxu1  ;;  %v605_v22 = vadd.f32 %v601_v14, %v138_v10 }
  0xe5   :  { %v4612_v23 = vadd.f32 %v4009_v15, %v3748_v60  ;;  %v4017_v27 = vpop.f32.mrf.mxu0 }
  0xe6   :  { %v505_v30 = vpop.f32.mrf.mxu1  ;;  %v3760_v32 = vmul.f32 -1.442695, %v605_v22 }
  0xe7   :  { %v4614_v34 = vadd.f32 %v3748_v60, %v505_v30  ;;  %v755_v37 = vpop.f32.mrf.mxu0 }
  0xe8   :  { %v4012_v39 = vpop.f32.mrf.mxu1  ;;  %4230 = vpow2.f32 %v3760_v32  ;;  %v759_v10 = vadd.f32 %v755_v37, %v370_v5  ;;  %v843_v37 = vld [vmem:[%s4877_s4] sm:$0xff] }
  0xe9   :  { %v4616_v41 = vadd.f32 %v4012_v39, %v3748_v60  ;;  %v4027_v21 = vpop.f32.mrf.mxu0  ;;  %v1155_v39 = vld [vmem:[%s4877_s4 + $0x8] sm:$0xff] }
  0xea   :  { %v515_v26 = vpop.f32.mrf.mxu1 }
  0xeb   :  { %v4618_v46 = vadd.f32 %v3748_v60, %v515_v26 }
  0xec   :  { %v678_v47 = vpop.f32.mrf.mxu1 }
  0xed   :  { %v682_v51 = vadd.f32 %v678_v47, %v254_v44 }
  0xee   :  { %v4022_v53 = vpop.f32.mrf.mxu1 }
  0xef   :  { %v3761_v54 = vmul.f32 -1.442695, %v682_v51 }
  0xf0   :  { %v827_v57 = vpop.f32.mrf.mxu1 }
  0xf1   :  { %4232 = vpow2.f32 %v3761_v54  ;;  %v831_v0 = vadd.f32 %v827_v57, %v486_v62 }
  0xf2   :  { %v4032_v58 = vpop.f32.mrf.mxu1 }
  0xf3   :  { %v3762_v7 = vmul.f32 -1.442695, %v831_v0 }
  0xf5   :  { %v4231_v2 = vpop.eup %4230  ;;  %4234 = vpow2.f32 %v3762_v7 }
  0xf6   :  { %v609_v9 = vadd.f32 1.0, %v4231_v2 }
  0xf8   :  { %4236 = vrcp.f32 %v609_v9 }
  0xf9   :  { %4238 = vtanh.f32 %v759_v10 }
  0xfe   :  { %v4233_v12 = vpop.eup %4232 }
  0xff   :  { %v686_v29 = vadd.f32 1.0, %v4233_v12 }
 0x101   :  { %4240 = vrcp.f32 %v686_v29 }
 0x102   :  { %v4235_v36 = vpop.eup %4234 }
 0x103   :  { %v835_v27 = vadd.f32 1.0, %v4235_v36 }
 0x105   :  { %v4237_v14 = vpop.eup %4236  ;;  %4242 = vrcp.f32 %v835_v27 }
 0x106   :  { %v4239_v15 = vpop.eup %4238 }
 0x107   :  { %v839_v32 = vmul.f32 %v4239_v15, %v4237_v14 }
 0x10e   :  { %v4241_v22 = vpop.eup %4240 }
 0x10f   :  { %v838_v30 = vmul.f32 0.0, %v4241_v22 }
 0x111   :  { %v4620_v60 = vadd.f32 %v839_v32, %v838_v30 }
 0x112   :  { %v4243_v42 = vpop.eup %4242 }
 0x113   :  { %4244 = vtanh.f32 %v4620_v60 }
 0x120   :  { %v4245_v50 = vpop.eup %4244 }
 0x121   :  { %v842_v4 = vmul.f32 %v4245_v50, %v4243_v42 }
 0x123   :  { %4036 = vmatmul.mubr.msk.f32.vlgmr.msra.gmra.mxu0 %vm531_vm2, %v842_v4  ;;  %4041 = vmatmul.mubr.msk.f32.vlgmr.msra.gmra.mxu1 %vm531_vm2, %v842_v4 }
 0x124   :  { %4044 = vmatpush3.msra.mxu0 %v4518_v19  ;;  %4045 = vmatprep.mubr.msk.f32.mxu0 %vm4364_vm1, %v4363_v16 }
 0x125   :  { %4049 = vmatpush3.msra.mxu1 %v4539_v20  ;;  %4050 = vmatprep.mubr.msk.f32.mxu1 %vm4364_vm1, %v4363_v16 }
 0x126   :  { %4058 = vmatprep.subr.mxu1 %v4363_v16  ;;  %4053 = vmatprep.subr.mxu0 %v4363_v16 }
 0x127   :  { %4046 = vmatmul.mubr.msk.f32.vlgmr.msra.gmra.mxu0 %vm531_vm2, %v842_v4  ;;  %4051 = vmatmul.mubr.msk.f32.vlgmr.msra.gmra.mxu1 %vm531_vm2, %v842_v4 }
 0x128   :  { %4059 = vmatpush3.msra.mxu1 %v843_v37  ;;  %4060 = vmatprep.mubr.msk.f32.mxu1 %vm4364_vm1, %v4363_v16 }
 0x129   :  { %4068 = vmatprep.subr.mxu1 %v4363_v16  ;;  %4055 = vmatprep.mubr.msk.f32.mxu0 %vm4364_vm1, %v4363_v16 }
 0x12a   :  { %4054 = vmatpush3.msra.mxu0 %v1155_v39 }
 0x12b   :  { %4061 = vmatmul.mubr.msk.f32.vlgmr.msra.gmra.mxu1 %vm531_vm2, %v842_v4  ;;  %4063 = vmatprep.subr.mxu0 %v4363_v16 }
 0x12c   :  { %4069 = vmatpush3.msra.mxu1 %v4500_v18  ;;  %4070 = vmatprep.mubr.msk.f32.mxu1 %vm4364_vm1, %v4363_v16 }
 0x12d   :  { %4078 = vmatprep.subr.mxu1 %v4363_v16 }
 0x1e3   :  { %v913_v21 = vpop.f32.mrf.mxu0  ;;  %v990_v26 = vpop.f32.mrf.mxu1 }
 0x1e4   :  { %v917_v44 = vadd.f32 %v913_v21, %v4555_v24  ;;  %v994_v47 = vadd.f32 %v990_v26, %v4566_v33 }
 0x1e5   :  { %v4037_v51 = vpop.f32.mrf.mxu0  ;;  %v4042_v53 = vpop.f32.mrf.mxu1 }
 0x1e6   :  { %v3764_v54 = vmul.f32 -1.442695, %v917_v44  ;;  %v3766_v57 = vmul.f32 -1.442695, %v994_v47 }
 0x1e7   :  { %v1067_v58 = vpop.f32.mrf.mxu0  ;;  %v1139_v62 = vpop.f32.mrf.mxu1 }
 0x1e8   :  { %4246 = vpow2.f32 %v3764_v54  ;;  %v1143_v9 = vadd.f32 %v1139_v62, %v4600_v1  ;;  %v1071_v24 = vadd.f32 %v1067_v58, %v4581_v48 }
 0x1e9   :  { %4248 = vpow2.f32 %v3766_v57  ;;  %v4047_v0 = vpop.f32.mrf.mxu0  ;;  %v4052_v2 = vpop.f32.mrf.mxu1 }
 0x1ea   :  { %v3769_v10 = vmul.f32 -1.442695, %v1143_v9 }
 0x1eb   :  { %v4654_v5 = vpop.f32.mrf.mxu1 }
 0x1ec   :  { %4250 = vpow2.f32 %v3769_v10 }
 0x1ed   :  { %v4062_v7 = vpop.f32.mrf.mxu1  ;;  %4252 = vtanh.f32 %v1071_v24 }
 0x1f5   :  { %v4247_v12 = vpop.eup %4246 }
 0x1f6   :  { %v4249_v33 = vpop.eup %4248  ;;  %v921_v29 = vadd.f32 1.0, %v4247_v12 }
 0x1f7   :  { %v998_v36 = vadd.f32 1.0, %v4249_v33 }
 0x1f8   :  { %4254 = vrcp.f32 %v921_v29 }
 0x1f9   :  { %4256 = vrcp.f32 %v998_v36  ;;  %v4251_v14 = vpop.eup %4250 }
 0x1fa   :  { %v4253_v15 = vpop.eup %4252  ;;  %v1147_v32 = vadd.f32 1.0, %v4251_v14 }
 0x1fc   :  { %4258 = vrcp.f32 %v1147_v32 }
 0x205   :  { %v4255_v22 = vpop.eup %4254 }
 0x206   :  { %v4257_v27 = vpop.eup %4256  ;;  %v1151_v30 = vmul.f32 %v4255_v22, %v4253_v15 }
 0x207   :  { %v1150_v42 = vmul.f32 %v4257_v27, %v4620_v60  ;;  %v1607_v60 = vld [vmem:[%s4877_s4 + $0x10] sm:$0xff] }
 0x209   :  { %v1152_v1 = vadd.f32 %v1151_v30, %v1150_v42  ;;  %v4259_v48 = vpop.eup %4258 }
 0x20b   :  { %4260 = vtanh.f32 %v1152_v1 }
 0x218   :  { %v4261_v50 = vpop.eup %4260 }
 0x219   :  { %v1154_v4 = vmul.f32 %v4261_v50, %v4259_v48 }
 0x21b   :  { %4056 = vmatmul.mubr.msk.f32.vlgmr.msra.gmra.mxu0 %vm531_vm2, %v1154_v4  ;;  %4071 = vmatmul.mubr.msk.f32.vlgmr.msra.gmra.mxu1 %vm531_vm2, %v1154_v4 }
 0x21c   :  { %4064 = vmatpush3.msra.mxu0 %v4483_v17  ;;  %4065 = vmatprep.mubr.msk.f32.mxu0 %vm4364_vm1, %v4363_v16 }
 0x21d   :  { %4079 = vmatpush3.msra.mxu1 %v4539_v20  ;;  %4080 = vmatprep.mubr.msk.f32.mxu1 %vm4364_vm1, %v4363_v16 }
 0x21e   :  { %4073 = vmatprep.subr.mxu0 %v4363_v16  ;;  %4088 = vmatprep.subr.mxu1 %v4363_v16 }
 0x21f   :  { %4066 = vmatmul.mubr.msk.f32.vlgmr.msra.gmra.mxu0 %vm531_vm2, %v1154_v4  ;;  %4081 = vmatmul.mubr.msk.f32.vlgmr.msra.gmra.mxu1 %vm531_vm2, %v1154_v4 }
 0x220   :  { %4074 = vmatpush3.msra.mxu0 %v4518_v19  ;;  %4075 = vmatprep.mubr.msk.f32.mxu0 %vm4364_vm1, %v4363_v16 }
 0x221   :  { %4083 = vmatprep.subr.mxu0 %v4363_v16  ;;  %4089 = vmatpush3.msra.mxu1 %v4483_v17 }
 0x222   :  { %4090 = vmatprep.mubr.msk.f32.mxu1 %vm4364_vm1, %v4363_v16  ;;  %4098 = vmatprep.subr.mxu1 %v4363_v16 }
 0x223   :  { %4076 = vmatmul.mubr.msk.f32.vlgmr.msra.gmra.mxu0 %vm531_vm2, %v1154_v4 }
 0x224   :  { %4085 = vmatprep.mubr.msk.f32.mxu0 %vm4364_vm1, %v4363_v16  ;;  %4084 = vmatpush3.msra.mxu0 %v1607_v60 }
 0x225   :  { %4093 = vmatprep.subr.mxu0 %v4363_v16 }
 0x2db   :  { %v1225_v37 = vpop.f32.mrf.mxu0  ;;  %v1442_v39 = vpop.f32.mrf.mxu1 }
 0x2dc   :  { %v1446_v21 = vadd.f32 %v1442_v39, %v4579_v45 }
 0x2dd   :  { %v4057_v26 = vpop.f32.mrf.mxu0  ;;  %v4072_v44 = vpop.f32.mrf.mxu1 }
 0x2de   :  { %v3775_v47 = vmul.f32 -1.442695, %v1446_v21 }
 0x2df   :  { %v1365_v51 = vpop.f32.mrf.mxu0  ;;  %v1591_v53 = vpop.f32.mrf.mxu1 }
 0x2e0   :  { %4262 = vpow2.f32 %v3775_v47  ;;  %v1369_v54 = vadd.f32 %v1365_v51, %v4568_v35  ;;  %v1595_v7 = vadd.f32 %v1591_v53, %v4610_v13 }
 0x2e1   :  { %v4067_v57 = vpop.f32.mrf.mxu0  ;;  %v4082_v58 = vpop.f32.mrf.mxu1 }
 0x2e2   :  { %v3773_v62 = vmul.f32 -1.442695, %v1369_v54  ;;  %v3778_v10 = vmul.f32 -1.442695, %v1595_v7 }
 0x2e3   :  { %v1519_v0 = vpop.f32.mrf.mxu0 }
 0x2e4   :  { %4264 = vpow2.f32 %v3773_v62  ;;  %v1523_v45 = vadd.f32 %v1519_v0, %v4591_v59  ;;  %v1990_v59 = vld [vmem:[%s4877_s4 + $0x18] sm:$0xff] }
 0x2e5   :  { %v4077_v2 = vpop.f32.mrf.mxu0  ;;  %4266 = vpow2.f32 %v3778_v10 }
 0x2ed   :  { %v4263_v9 = vpop.eup %4262 }
 0x2ee   :  { %v1450_v24 = vadd.f32 1.0, %v4263_v9 }
 0x2f0   :  { %4268 = vrcp.f32 %v1450_v24 }
 0x2f1   :  { %v4265_v12 = vpop.eup %4264  ;;  %4270 = vtanh.f32 %v1523_v45 }
 0x2f2   :  { %v1373_v33 = vadd.f32 1.0, %v4265_v12  ;;  %v4267_v35 = vpop.eup %4266 }
 0x2f3   :  { %v1599_v15 = vadd.f32 1.0, %v4267_v35 }
 0x2f4   :  { %4272 = vrcp.f32 %v1373_v33 }
 0x2f5   :  { %4274 = vrcp.f32 %v1599_v15 }
 0x2fd   :  { %v4269_v29 = vpop.eup %4268 }
 0x2fe   :  { %v4271_v36 = vpop.eup %4270  ;;  %v1602_v22 = vmul.f32 %v4269_v29, %v1152_v1  ;;  %v1296_v1 = vadd.f32 %v4654_v5, %v1225_v37 }
 0x301   :  { %v4273_v14 = vpop.eup %4272 }
 0x302   :  { %v1603_v27 = vmul.f32 %v4273_v14, %v4271_v36  ;;  %v4275_v13 = vpop.eup %4274  ;;  %v2373_v14 = vld [vmem:[%s4877_s4 + $0x20] sm:$0xff] }
 0x304   :  { %v1604_v30 = vadd.f32 %v1603_v27, %v1602_v22 }
 0x306   :  { %4276 = vtanh.f32 %v1604_v30 }
 0x313   :  { %v4277_v32 = vpop.eup %4276 }
 0x314   :  { %v1606_v42 = vmul.f32 %v4277_v32, %v4275_v13 }
 0x316   :  { %4086 = vmatmul.mubr.msk.f32.vlgmr.msra.gmra.mxu0 %vm531_vm2, %v1606_v42  ;;  %4091 = vmatmul.mubr.msk.f32.vlgmr.msra.gmra.mxu1 %vm531_vm2, %v1606_v42 }
 0x317   :  { %4094 = vmatpush3.msra.mxu0 %v4500_v18  ;;  %4095 = vmatprep.mubr.msk.f32.mxu0 %vm4364_vm1, %v4363_v16 }
 0x318   :  { %4099 = vmatpush3.msra.mxu1 %v4518_v19  ;;  %4100 = vmatprep.mubr.msk.f32.mxu1 %vm4364_vm1, %v4363_v16 }
 0x319   :  { %4103 = vmatprep.subr.mxu0 %v4363_v16  ;;  %4108 = vmatprep.subr.mxu1 %v4363_v16 }
 0x31a   :  { %4096 = vmatmul.mubr.msk.f32.vlgmr.msra.gmra.mxu0 %vm531_vm2, %v1606_v42  ;;  %4101 = vmatmul.mubr.msk.f32.vlgmr.msra.gmra.mxu1 %vm531_vm2, %v1606_v42 }
 0x31b   :  { %4104 = vmatpush3.msra.mxu0 %v4539_v20  ;;  %4105 = vmatprep.mubr.msk.f32.mxu0 %vm4364_vm1, %v4363_v16 }
 0x31c   :  { %4113 = vmatprep.subr.mxu0 %v4363_v16  ;;  %4110 = vmatprep.mubr.msk.f32.mxu1 %vm4364_vm1, %v4363_v16 }
 0x31d   :  { %4109 = vmatpush3.msra.mxu1 %v1990_v59 }
 0x31e   :  { %4106 = vmatmul.mubr.msk.f32.vlgmr.msra.gmra.mxu0 %vm531_vm2, %v1606_v42  ;;  %4118 = vmatprep.subr.mxu1 %v4363_v16 }
 0x31f   :  { %4114 = vmatpush3.msra.mxu0 %v4483_v17  ;;  %4115 = vmatprep.mubr.msk.f32.mxu0 %vm4364_vm1, %v4363_v16 }
 0x320   :  { %4123 = vmatprep.subr.mxu0 %v4363_v16 }
 0x3d6   :  { %v1677_v48 = vpop.f32.mrf.mxu0  ;;  %v1748_v50 = vpop.f32.mrf.mxu1 }
 0x3d7   :  { %v1681_v4 = vadd.f32 %v1677_v48, %v1296_v1  ;;  %v1752_v60 = vadd.f32 %v1748_v50, %v4564_v31 }
 0x3d8   :  { %v4087_v39 = vpop.f32.mrf.mxu0  ;;  %v4092_v21 = vpop.f32.mrf.mxu1 }
 0x3d9   :  { %v3781_v26 = vmul.f32 -1.442695, %v1752_v60 }
 0x3da   :  { %v1825_v44 = vpop.f32.mrf.mxu0  ;;  %v1902_v47 = vpop.f32.mrf.mxu1 }
 0x3db   :  { %4278 = vpow2.f32 %v3781_v26  ;;  %v1829_v51 = vadd.f32 %v1825_v44, %v4572_v40  ;;  %v1906_v37 = vadd.f32 %v1902_v47, %v4587_v55 }
 0x3dc   :  { %v4097_v53 = vpop.f32.mrf.mxu0  ;;  %v4102_v54 = vpop.f32.mrf.mxu1 }
 0x3dd   :  { %v3783_v57 = vmul.f32 -1.442695, %v1829_v51 }
 0x3de   :  { %v1974_v58 = vpop.f32.mrf.mxu0 }
 0x3df   :  { %4280 = vpow2.f32 %v3783_v57  ;;  %v1978_v5 = vadd.f32 %v1974_v58, %v4606_v8 }
 0x3e0   :  { %v4107_v62 = vpop.f32.mrf.mxu0  ;;  %4282 = vtanh.f32 %v1906_v37 }
 0x3e1   :  { %v3786_v31 = vmul.f32 -1.442695, %v1978_v5 }
 0x3e8   :  { %v4279_v0 = vpop.eup %4278 }
 0x3e9   :  { %v1756_v2 = vadd.f32 1.0, %v4279_v0 }
 0x3eb   :  { %4284 = vrcp.f32 %v1756_v2 }
 0x3ec   :  { %v4281_v7 = vpop.eup %4280  ;;  %4286 = vpow2.f32 %v3786_v31 }
 0x3ed   :  { %v1833_v9 = vadd.f32 1.0, %v4281_v7  ;;  %v4283_v40 = vpop.eup %4282  ;;  %v2756_v7 = vld [vmem:[%s4877_s4 + $0x28] sm:$0xff] }
 0x3ef   :  { %4288 = vrcp.f32 %v1833_v9 }
 0x3f8   :  { %v4285_v10 = vpop.eup %4284 }
 0x3f9   :  { %v4287_v24 = vpop.eup %4286  ;;  %v1986_v45 = vmul.f32 %v4285_v10, %v4283_v40 }
 0x3fa   :  { %v1982_v33 = vadd.f32 1.0, %v4287_v24 }
 0x3fc   :  { %v4289_v12 = vpop.eup %4288  ;;  %4290 = vrcp.f32 %v1982_v33 }
 0x3fd   :  { %v1985_v35 = vmul.f32 %v4289_v12, %v1604_v30 }
 0x3ff   :  { %v1987_v29 = vadd.f32 %v1986_v45, %v1985_v35 }
 0x401   :  { %4292 = vtanh.f32 %v1987_v29 }
 0x409   :  { %v4291_v55 = vpop.eup %4290 }
 0x40e   :  { %v4293_v8 = vpop.eup %4292 }
 0x40f   :  { %v1989_v36 = vmul.f32 %v4293_v8, %v4291_v55 }
 0x411   :  { %4111 = vmatmul.mubr.msk.f32.vlgmr.msra.gmra.mxu1 %vm531_vm2, %v1989_v36  ;;  %4116 = vmatmul.mubr.msk.f32.vlgmr.msra.gmra.mxu0 %vm531_vm2, %v1989_v36 }
 0x412   :  { %4119 = vmatpush3.msra.mxu1 %v4500_v18  ;;  %4120 = vmatprep.mubr.msk.f32.mxu1 %vm4364_vm1, %v4363_v16 }
 0x413   :  { %4124 = vmatpush3.msra.mxu0 %v4518_v19  ;;  %4125 = vmatprep.mubr.msk.f32.mxu0 %vm4364_vm1, %v4363_v16 }
 0x414   :  { %4128 = vmatprep.subr.mxu1 %v4363_v16  ;;  %4133 = vmatprep.subr.mxu0 %v4363_v16 }
 0x415   :  { %4121 = vmatmul.mubr.msk.f32.vlgmr.msra.gmra.mxu1 %vm531_vm2, %v1989_v36  ;;  %4126 = vmatmul.mubr.msk.f32.vlgmr.msra.gmra.mxu0 %vm531_vm2, %v1989_v36 }
 0x416   :  { %4129 = vmatpush3.msra.mxu1 %v4539_v20  ;;  %4130 = vmatprep.mubr.msk.f32.mxu1 %vm4364_vm1, %v4363_v16 }
 0x417   :  { %4138 = vmatprep.subr.mxu1 %v4363_v16  ;;  %4135 = vmatprep.mubr.msk.f32.mxu0 %vm4364_vm1, %v4363_v16 }
 0x418   :  { %4134 = vmatpush3.msra.mxu0 %v2373_v14 }
 0x419   :  { %4131 = vmatmul.mubr.msk.f32.vlgmr.msra.gmra.mxu1 %vm531_vm2, %v1989_v36  ;;  %4143 = vmatprep.subr.mxu0 %v4363_v16 }
 0x41a   :  { %4139 = vmatpush3.msra.mxu1 %v4483_v17  ;;  %4140 = vmatprep.mubr.msk.f32.mxu1 %vm4364_vm1, %v4363_v16 }
 0x41b   :  { %4148 = vmatprep.subr.mxu1 %v4363_v16 }
 0x4d1   :  { %v2060_v15 = vpop.f32.mrf.mxu1  ;;  %v2131_v22 = vpop.f32.mrf.mxu0 }
 0x4d2   :  { %v2064_v27 = vadd.f32 %v2060_v15, %v1681_v4  ;;  %v2135_v30 = vadd.f32 %v2131_v22, %v4577_v43 }
 0x4d3   :  { %v4112_v13 = vpop.f32.mrf.mxu1  ;;  %v4117_v32 = vpop.f32.mrf.mxu0 }
 0x4d4   :  { %v3789_v42 = vmul.f32 -1.442695, %v2135_v30 }
 0x4d5   :  { %v2208_v59 = vpop.f32.mrf.mxu1  ;;  %v2285_v1 = vpop.f32.mrf.mxu0 }
 0x4d6   :  { %4294 = vpow2.f32 %v3789_v42  ;;  %v2212_v48 = vadd.f32 %v2208_v59, %v4585_v52  ;;  %v2289_v4 = vadd.f32 %v2285_v1, %v4602_v3 }
 0x4d7   :  { %v4122_v50 = vpop.f32.mrf.mxu1  ;;  %v4127_v60 = vpop.f32.mrf.mxu0 }
 0x4d8   :  { %v3791_v39 = vmul.f32 -1.442695, %v2212_v48 }
 0x4d9   :  { %v2357_v21 = vpop.f32.mrf.mxu1 }
 0x4da   :  { %4296 = vpow2.f32 %v3791_v39  ;;  %v2361_v44 = vadd.f32 %v2357_v21, %v4614_v34 }
 0x4db   :  { %v4132_v26 = vpop.f32.mrf.mxu1  ;;  %4298 = vtanh.f32 %v2289_v4 }
 0x4dc   :  { %v3794_v43 = vmul.f32 -1.442695, %v2361_v44 }
 0x4e3   :  { %v4295_v47 = vpop.eup %4294 }
 0x4e4   :  { %v2139_v51 = vadd.f32 1.0, %v4295_v47 }
 0x4e6   :  { %4300 = vrcp.f32 %v2139_v51 }
 0x4e7   :  { %v4297_v53 = vpop.eup %4296  ;;  %4302 = vpow2.f32 %v3794_v43 }
 0x4e8   :  { %v2216_v54 = vadd.f32 1.0, %v4297_v53  ;;  %v4299_v52 = vpop.eup %4298 }
 0x4ea   :  { %4304 = vrcp.f32 %v2216_v54 }
 0x4f3   :  { %v4301_v57 = vpop.eup %4300 }
 0x4f4   :  { %v4303_v58 = vpop.eup %4302  ;;  %v2369_v62 = vmul.f32 %v4301_v57, %v4299_v52 }
 0x4f5   :  { %v2365_v37 = vadd.f32 1.0, %v4303_v58 }
 0x4f7   :  { %v4305_v5 = vpop.eup %4304  ;;  %4306 = vrcp.f32 %v2365_v37 }
 0x4f8   :  { %v2368_v0 = vmul.f32 %v4305_v5, %v1987_v29 }
 0x4fa   :  { %v2370_v31 = vadd.f32 %v2369_v62, %v2368_v0 }
 0x4fc   :  { %4308 = vtanh.f32 %v2370_v31 }
 0x504   :  { %v4307_v3 = vpop.eup %4306 }
 0x509   :  { %v4309_v34 = vpop.eup %4308 }
 0x50a   :  { %v2372_v2 = vmul.f32 %v4309_v34, %v4307_v3 }
 0x50c   :  { %4136 = vmatmul.mubr.msk.f32.vlgmr.msra.gmra.mxu0 %vm531_vm2, %v2372_v2  ;;  %4141 = vmatmul.mubr.msk.f32.vlgmr.msra.gmra.mxu1 %vm531_vm2, %v2372_v2 }
 0x50d   :  { %4144 = vmatpush3.msra.mxu0 %v4500_v18  ;;  %4145 = vmatprep.mubr.msk.f32.mxu0 %vm4364_vm1, %v4363_v16 }
 0x50e   :  { %4149 = vmatpush3.msra.mxu1 %v4518_v19  ;;  %4150 = vmatprep.mubr.msk.f32.mxu1 %vm4364_vm1, %v4363_v16 }
 0x50f   :  { %4153 = vmatprep.subr.mxu0 %v4363_v16  ;;  %4158 = vmatprep.subr.mxu1 %v4363_v16 }
 0x510   :  { %4146 = vmatmul.mubr.msk.f32.vlgmr.msra.gmra.mxu0 %vm531_vm2, %v2372_v2  ;;  %4151 = vmatmul.mubr.msk.f32.vlgmr.msra.gmra.mxu1 %vm531_vm2, %v2372_v2 }
 0x511   :  { %4154 = vmatpush3.msra.mxu0 %v4539_v20  ;;  %4155 = vmatprep.mubr.msk.f32.mxu0 %vm4364_vm1, %v4363_v16 }
 0x512   :  { %4163 = vmatprep.subr.mxu0 %v4363_v16  ;;  %4160 = vmatprep.mubr.msk.f32.mxu1 %vm4364_vm1, %v4363_v16 }
 0x513   :  { %4159 = vmatpush3.msra.mxu1 %v2756_v7 }
 0x514   :  { %4156 = vmatmul.mubr.msk.f32.vlgmr.msra.gmra.mxu0 %vm531_vm2, %v2372_v2  ;;  %4168 = vmatprep.subr.mxu1 %v4363_v16 }
 0x515   :  { %4164 = vmatpush3.msra.mxu0 %v4483_v17  ;;  %4165 = vmatprep.mubr.msk.f32.mxu0 %vm4364_vm1, %v4363_v16 }
 0x516   :  { %4173 = vmatprep.subr.mxu0 %v4363_v16 }
 0x5cc   :  { %v2443_v9 = vpop.f32.mrf.mxu0  ;;  %v2514_v40 = vpop.f32.mrf.mxu1 }
 0x5cd   :  { %v2447_v10 = vadd.f32 %v2443_v9, %v2064_v27  ;;  %v2518_v24 = vadd.f32 %v2514_v40, %v4570_v38 }
 0x5ce   :  { %v4137_v45 = vpop.f32.mrf.mxu0  ;;  %v4142_v12 = vpop.f32.mrf.mxu1 }
 0x5cf   :  { %v3797_v33 = vmul.f32 -1.442695, %v2518_v24 }
 0x5d0   :  { %v2591_v35 = vpop.f32.mrf.mxu0  ;;  %v2668_v29 = vpop.f32.mrf.mxu1 }
 0x5d1   :  { %4310 = vpow2.f32 %v3797_v33  ;;  %v2595_v55 = vadd.f32 %v2591_v35, %v4583_v49  ;;  %v2672_v27 = vadd.f32 %v2668_v29, %v4598_v63 }
 0x5d2   :  { %v4147_v8 = vpop.f32.mrf.mxu0  ;;  %v4152_v36 = vpop.f32.mrf.mxu1 }
 0x5d3   :  { %v3799_v14 = vmul.f32 -1.442695, %v2595_v55  ;;  %v4362_v8 = vld [vmem:[%s4875_s2 + $0x8] sm:$0xff] }
 0x5d4   :  { %v2740_v15 = vpop.f32.mrf.mxu0 }
 0x5d5   :  { %4312 = vpow2.f32 %v3799_v14  ;;  %v2744_v30 = vadd.f32 %v2740_v15, %v4612_v23 }
 0x5d6   :  { %v4157_v22 = vpop.f32.mrf.mxu0  ;;  %4314 = vtanh.f32 %v2672_v27 }
 0x5d7   :  { %v3802_v38 = vmul.f32 -1.442695, %v2744_v30 }
 0x5de   :  { %v4311_v13 = vpop.eup %4310 }
 0x5df   :  { %v2522_v32 = vadd.f32 1.0, %v4311_v13 }
 0x5e1   :  { %4316 = vrcp.f32 %v2522_v32 }
 0x5e2   :  { %v4313_v42 = vpop.eup %4312  ;;  %4318 = vpow2.f32 %v3802_v38 }
 0x5e3   :  { %v2599_v59 = vadd.f32 1.0, %v4313_v42  ;;  %v4315_v49 = vpop.eup %4314 }
 0x5e5   :  { %4320 = vrcp.f32 %v2599_v59 }
 0x5ee   :  { %v4317_v1 = vpop.eup %4316 }
 0x5ef   :  { %v4319_v48 = vpop.eup %4318  ;;  %v2752_v50 = vmul.f32 %v4317_v1, %v4315_v49 }
 0x5f0   :  { %v2748_v39 = vadd.f32 1.0, %v4319_v48 }
 0x5f2   :  { %v4321_v60 = vpop.eup %4320  ;;  %4322 = vrcp.f32 %v2748_v39 }
 0x5f3   :  { %v2751_v21 = vmul.f32 %v4321_v60, %v2370_v31 }
 0x5f5   :  { %v2753_v26 = vadd.f32 %v2752_v50, %v2751_v21 }
 0x5f7   :  { %4324 = vtanh.f32 %v2753_v26 }
 0x5ff   :  { %v4323_v63 = vpop.eup %4322 }
 0x604   :  { %v4325_v23 = vpop.eup %4324 }
 0x605   :  { %v2755_v44 = vmul.f32 %v4325_v23, %v4323_v63 }
 0x607   :  { %4161 = vmatmul.mubr.msk.f32.vlgmr.msra.gmra.mxu1 %vm531_vm2, %v2755_v44  ;;  %4166 = vmatmul.mubr.msk.f32.vlgmr.msra.gmra.mxu0 %vm531_vm2, %v2755_v44 }
 0x608   :  { %4169 = vmatpush3.msra.mxu1 %v4500_v18  ;;  %4170 = vmatprep.mubr.msk.f32.mxu1 %vm4364_vm1, %v4363_v16  ;;  %v3139_v18 = vld [vmem:[%s4877_s4 + $0x30] sm:$0xff] }
 0x609   :  { %4174 = vmatpush3.msra.mxu0 %v4518_v19  ;;  %4175 = vmatprep.mubr.msk.f32.mxu0 %vm4364_vm1, %v4363_v16 }
 0x60a   :  { %4178 = vmatprep.subr.mxu1 %v4363_v16  ;;  %4183 = vmatprep.subr.mxu0 %v4363_v16 }
 0x60b   :  { %4171 = vmatmul.mubr.msk.f32.vlgmr.msra.gmra.mxu1 %vm531_vm2, %v2755_v44  ;;  %4176 = vmatmul.mubr.msk.f32.vlgmr.msra.gmra.mxu0 %vm531_vm2, %v2755_v44 }
 0x60c   :  { %4179 = vmatpush3.msra.mxu1 %v4539_v20  ;;  %4180 = vmatprep.mubr.msk.f32.mxu1 %vm4364_vm1, %v4363_v16 }
 0x60d   :  { %4188 = vmatprep.subr.mxu1 %v4363_v16  ;;  %4185 = vmatprep.mubr.msk.f32.mxu0 %vm4364_vm1, %v4363_v16 }
 0x60e   :  { %4184 = vmatpush3.msra.mxu0 %v3139_v18 }
 0x60f   :  { %4181 = vmatmul.mubr.msk.f32.vlgmr.msra.gmra.mxu1 %vm531_vm2, %v2755_v44  ;;  %4193 = vmatprep.subr.mxu0 %v4363_v16 }
 0x610   :  { %4189 = vmatpush3.msra.mxu1 %v4483_v17  ;;  %4190 = vmatprep.mubr.msk.f32.mxu1 %vm4364_vm1, %v4363_v16 }
 0x611   :  { %4198 = vmatprep.subr.mxu1 %v4363_v16 }
 0x6c7   :  { %v2826_v4 = vpop.f32.mrf.mxu1  ;;  %v2897_v47 = vpop.f32.mrf.mxu0 }
 0x6c8   :  { %v2830_v43 = vadd.f32 %v2826_v4, %v2447_v10  ;;  %v2901_v51 = vadd.f32 %v2897_v47, %v4559_v28 }
 0x6c9   :  { %v4162_v53 = vpop.f32.mrf.mxu1  ;;  %v4167_v54 = vpop.f32.mrf.mxu0 }
 0x6ca   :  { %v3805_v17 = vmul.f32 -1.442695, %v2901_v51  ;;  %v3609_v54 = vld [vmem:[%s4878_s6 + $0x18] sm:$0x3] }
 0x6cb   :  { %v2974_v52 = vpop.f32.mrf.mxu1  ;;  %v3051_v57 = vpop.f32.mrf.mxu0 }
 0x6cc   :  { %4326 = vpow2.f32 %v3805_v17  ;;  %v2978_v58 = vadd.f32 %v2974_v52, %v4596_v61  ;;  %v3055_v34 = vadd.f32 %v3051_v57, %v4608_v11  ;;  %v3608_v17 = vld [vmem:[%s4878_s6 + $0x10] sm:$0xff]  ;;  %v3607_v52 = vld [vmem:[%s4878_s6 + $0x8] sm:$0xff]  ;;  %v3606_v57 = vld [vmem:[%s4878_s6] sm:$0xff] }
 0x6cd   :  { %v4172_v62 = vpop.f32.mrf.mxu1  ;;  %v4177_v5 = vpop.f32.mrf.mxu0 }
 0x6ce   :  { %v3807_v37 = vmul.f32 -1.442695, %v2978_v58  ;;  %v3820_v62 = vld [vmem:[%s4879_s5] ss:$0 sm:$0xff] }
 0x6cf   :  { %v3123_v0 = vpop.f32.mrf.mxu1 }
 0x6d0   :  { %4328 = vpow2.f32 %v3807_v37  ;;  %v3127_v3 = vadd.f32 %v3123_v0, %v4618_v46 }
 0x6d1   :  { %v4182_v31 = vpop.f32.mrf.mxu1  ;;  %4330 = vtanh.f32 %v3055_v34 }
 0x6d2   :  { %v3810_v28 = vmul.f32 -1.442695, %v3127_v3  ;;  %v3821_v3 = vld [vmem:[%s4880_s7] ss:$0 sm:$0xff] }
 0x6d9   :  { %v4327_v2 = vpop.eup %4326 }
 0x6da   :  { %v2905_v7 = vadd.f32 1.0, %v4327_v2 }
 0x6dc   :  { %4332 = vrcp.f32 %v2905_v7 }
 0x6dd   :  { %v4329_v9 = vpop.eup %4328  ;;  %4334 = vpow2.f32 %v3810_v28 }
 0x6de   :  { %v2982_v40 = vadd.f32 1.0, %v4329_v9  ;;  %v4331_v61 = vpop.eup %4330 }
 0x6e0   :  { %4336 = vrcp.f32 %v2982_v40 }
 0x6e9   :  { %v4333_v10 = vpop.eup %4332 }
 0x6ea   :  { %v4335_v24 = vpop.eup %4334  ;;  %v3135_v45 = vmul.f32 %v4333_v10, %v4331_v61 }
 0x6eb   :  { %v3131_v33 = vadd.f32 1.0, %v4335_v24 }
 0x6ed   :  { %v4337_v12 = vpop.eup %4336  ;;  %4338 = vrcp.f32 %v3131_v33 }
 0x6ee   :  { %v3134_v35 = vmul.f32 %v4337_v12, %v2753_v26 }
 0x6f0   :  { %v3136_v29 = vadd.f32 %v3135_v45, %v3134_v35 }
 0x6f2   :  { %4340 = vtanh.f32 %v3136_v29 }
 0x6fa   :  { %v4339_v11 = vpop.eup %4338 }
 0x6ff   :  { %v4341_v46 = vpop.eup %4340 }
 0x700   :  { %v3138_v55 = vmul.f32 %v4341_v46, %v4339_v11 }
 0x702   :  { %4186 = vmatmul.mubr.msk.f32.vlgmr.msra.gmra.mxu0 %vm531_vm2, %v3138_v55  ;;  %4191 = vmatmul.mubr.msk.f32.vlgmr.msra.gmra.mxu1 %vm531_vm2, %v3138_v55 }
 0x703   :  { %4194 = vmatpush3.msra.mxu0 %v4362_v8  ;;  %4195 = vmatprep.mubr.msk.f32.mxu0 %vm4364_vm1, %v4363_v16 }
 0x704   :  { %4199 = vmatpush3.msra.mxu1 %v4518_v19  ;;  %4200 = vmatprep.mubr.msk.f32.mxu1 %vm4364_vm1, %v4363_v16  ;;  %v3522_v19 = vld [vmem:[%s4877_s4 + $0x38] sm:$0xff] }
 0x705   :  { %4203 = vmatprep.subr.mxu0 %v4363_v16  ;;  %4208 = vmatprep.subr.mxu1 %v4363_v16 }
 0x706   :  { %4196 = vmatmul.mubr.msk.f32.vlgmr.msra.gmra.mxu0 %vm531_vm2, %v3138_v55  ;;  %4201 = vmatmul.mubr.msk.f32.vlgmr.msra.gmra.mxu1 %vm531_vm2, %v3138_v55 }
 0x707   :  { %4204 = vmatpush3.msra.mxu0 %v4539_v20  ;;  %4205 = vmatprep.mubr.msk.f32.mxu0 %vm4364_vm1, %v4363_v16 }
 0x708   :  { %4210 = vmatprep.mubr.msk.f32.mxu1 %vm4364_vm1, %v4363_v16  ;;  %4213 = vmatprep.subr.mxu0 %v4363_v16 }
 0x709   :  { %4209 = vmatpush3.msra.mxu1 %v3522_v19 }
 0x70a   :  { %4206 = vmatmul.mubr.msk.f32.vlgmr.msra.gmra.mxu0 %vm531_vm2, %v3138_v55 }
 0x70b   :  { %4221 = vmatprep.mubr.msk.f32.mxu0 %vm4364_vm1, %v4363_v16  ;;  %4214 = vmatpush3.msk.msra.mxu0 %vm3621_vm3, %v3609_v54 }
 0x70c   :  { %4215 = vmatprep.subr.mxu0 %v4363_v16 }
 0x70d   :  { %4216 = vmatpush3.msra.mxu0 %v3608_v17 }
 0x70e   :  { %4217 = vmatprep.subr.mxu0 %v4363_v16 }
 0x70f   :  { %4218 = vmatpush3.msra.mxu0 %v3607_v52 }
 0x710   :  { %4219 = vmatprep.subr.mxu0 %v4363_v16 }
 0x711   :  { %4220 = vmatpush3.msra.mxu0 %v3606_v57 }
 0x7c2   :  { %v3209_v36 = vpop.f32.mrf.mxu0  ;;  %v3280_v20 = vpop.f32.mrf.mxu1 }
 0x7c3   :  { %v3213_v14 = vadd.f32 %v3209_v36, %v2830_v43  ;;  %v3284_v15 = vadd.f32 %v3280_v20, %v4557_v25 }
 0x7c4   :  { %v4187_v22 = vpop.f32.mrf.mxu0  ;;  %v4192_v30 = vpop.f32.mrf.mxu1 }
 0x7c5   :  { %v3813_v27 = vmul.f32 -1.442695, %v3284_v15 }
 0x7c6   :  { %v3357_v13 = vpop.f32.mrf.mxu0  ;;  %v3434_v38 = vpop.f32.mrf.mxu1 }
 0x7c7   :  { %4342 = vpow2.f32 %v3813_v27  ;;  %v3361_v32 = vadd.f32 %v3357_v13, %v4589_v56  ;;  %v3438_v60 = vadd.f32 %v3434_v38, %v4604_v6 }
 0x7c8   :  { %v4197_v42 = vpop.f32.mrf.mxu0  ;;  %v4202_v59 = vpop.f32.mrf.mxu1 }
 0x7c9   :  { %v3815_v49 = vmul.f32 -1.442695, %v3361_v32 }
 0x7ca   :  { %v3506_v1 = vpop.f32.mrf.mxu0 }
 0x7cb   :  { %4344 = vpow2.f32 %v3815_v49  ;;  %v3510_v50 = vadd.f32 %v3506_v1, %v4616_v41 }
 0x7cc   :  { %v4207_v48 = vpop.f32.mrf.mxu0  ;;  %4346 = vtanh.f32 %v3438_v60 }
 0x7cd   :  { %v3818_v25 = vmul.f32 -1.442695, %v3510_v50 }
 0x7d4   :  { %v4343_v39 = vpop.eup %4342 }
 0x7d5   :  { %v3288_v21 = vadd.f32 1.0, %v4343_v39 }
 0x7d7   :  { %4348 = vrcp.f32 %v3288_v21 }
 0x7d8   :  { %v4345_v26 = vpop.eup %4344  ;;  %4350 = vpow2.f32 %v3818_v25 }
 0x7d9   :  { %v3365_v63 = vadd.f32 1.0, %v4345_v26  ;;  %v4347_v56 = vpop.eup %4346 }
 0x7db   :  { %4352 = vrcp.f32 %v3365_v63 }
 0x7e4   :  { %v4349_v23 = vpop.eup %4348 }
 0x7e5   :  { %v4351_v44 = vpop.eup %4350  ;;  %v3518_v18 = vmul.f32 %v4349_v23, %v4347_v56 }
 0x7e6   :  { %v3514_v47 = vadd.f32 1.0, %v4351_v44 }
 0x7e8   :  { %v4353_v4 = vpop.eup %4352  ;;  %4354 = vrcp.f32 %v3514_v47 }
 0x7e9   :  { %v3517_v43 = vmul.f32 %v4353_v4, %v3136_v29 }
 0x7eb   :  { %v3519_v51 = vadd.f32 %v3518_v18, %v3517_v43 }
 0x7ed   :  { %4356 = vtanh.f32 %v3519_v51 }
 0x7f5   :  { %v4355_v6 = vpop.eup %4354 }
 0x7fa   :  { %v4357_v41 = vpop.eup %4356 }
 0x7fb   :  { %v3521_v53 = vmul.f32 %v4357_v41, %v4355_v6 }
 0x7fd   :  { %4211 = vmatmul.mubr.msk.f32.vlgmr.msra.gmra.mxu1 %vm531_vm2, %v3521_v53 }
 0x8bd   :  { %v3592_v58 = vpop.f32.mrf.mxu1 }
 0x8be   :  { %v3596_v5 = vadd.f32 %v3592_v58, %v3213_v14 }
 0x8bf   :  { %v4212_v37 = vpop.f32.mrf.mxu1 }
 0x8c0   :  { %v3604_v0 = vadd.f32 %v3820_v62, %v3596_v5 }
 0x8c2   :  { %v3605_v31 = vmax.f32 %v3604_v0, 0.0 }
 0x8c4   :  { %4222 = vmatmul.mubr.msk.f32.vlgmr.msra.gmra.mxu0 %vm3617_vm4, %v3605_v31 }
 0x984   :  { %v3691_v34 = vpop.f32.mrf.mxu0 }
 0x985   :  { %v3692_v2 = vadd.f32 %v3821_v3, %v3691_v34 }
 0x986   :  { %v4223_v16 = vpop.f32.mrf.mxu0 }
 0x987   :  { %v3696_v28 = vsel %vm3695_vm5, %v3692_v2, -inf }
 0x988   :  { %3697 = vmax.xlane.f32.xlu0 %v3696_v28 }
 0xa11   :  { %v3698_v7 = vpop.xlane.xlu0 %3697 }
 0xa12   :  { %v3699_v9 = vsub.f32 %v3692_v2, %v3698_v7 }
 0xa14   :  { %v3700_v40 = vmul.f32 1.442695, %v3699_v9 }
 0xa16   :  { %4358 = vpow2.f32 %v3700_v40 }
 0xa23   :  { %v4359_v61 = vpop.eup %4358 }
 0xa24   :  { %v3702_v10 = vsel %vm3695_vm5, %v4359_v61, 0.0 }
 0xa25   :  { %3703 = vadd.xlane.f32.xlu0 %v3702_v10 }
 0xaae   :  { %v3704_v24 = vpop.xlane.xlu0 %3703 }
 0xaaf   :  { %4360 = vrcp.f32 %v3704_v24 }
 0xabc   :  { %v4361_v45 = vpop.eup %4360 }
 0xabd   :  { %v3706_v12 = vmul.f32 %v4361_v45, %v4359_v61 }
 0xabf   :  { %3707 = vst.msk [vmem:[%s4881_s8] sm:$0xff] %vm3695_vm5, %v3706_v12 }

</bundles_post_ra>
